<compile_context>
chip_gen: v6e
topology: v6e:2x2x1
jax: 0.10.0
libtpu: 0.0.40
codegen_flags: <defaults>
</compile_context>

<pallas_src>
import functools

import jax
import jax.numpy as jnp
import numpy as np
from jax import lax
from jax.experimental import pallas as pl
from jax.experimental.pallas import tpu as pltpu

# Review item: HIGH (3-pass bf16 emulation) roughly halves MXU passes and is
# expected to meet 1e-5 once re-validated; HIGHEST is kept as default because
# the MXU has huge slack here (K == n objects is tiny) and it guarantees the
# f32 tolerance of the correctness check.
_MXU_PRECISION = lax.Precision.HIGHEST


# ----------------------------------------------------------------------------
# Gaussian helpers
# ----------------------------------------------------------------------------
def _gaussian_1d(kernel_size: int) -> np.ndarray:
    """1-D factor of ObjectsToPoints._gaussian_2d: outer(g1, g1) == gauss2d/max."""
    assert kernel_size % 2 == 1, kernel_size
    k = kernel_size // 2
    sigma = (k + 1) / 3.0
    xs = np.arange(kernel_size, dtype=np.float64) - k
    g1 = np.exp(-(xs ** 2) / (2.0 * sigma ** 2))
    g1 = g1 / g1.max()                     # gauss2d.max() == g1.max() ** 2
    return g1.astype(np.float32)


def _gaussian_2d(kernel_size: int) -> np.ndarray:
    """Same as ObjectsToPoints._gaussian_2d (used by the pure-JAX reference)."""
    assert kernel_size % 2 == 1, kernel_size
    k = kernel_size // 2
    sigma = (k + 1) / 3.0
    xs = np.arange(kernel_size, dtype=np.float64) - k
    g1 = np.exp(-(xs ** 2) / (2.0 * sigma ** 2))
    g2 = g1[None, :] * g1[:, None]
    g2 /= g2.max()
    return g2.astype(np.float32)


def _gaussian_band_matrix(hw: int, kernel_size: int) -> np.ndarray:
    """Banded [hw, hw] matrix G with G[r, p] = g1[k + (r - p)] for |r-p| <= k.

    G @ onehot-profile == zero-padded 1-D gaussian smoothing (conv2d factor).
    """
    g1 = _gaussian_1d(kernel_size).astype(np.float64)
    k = kernel_size // 2
    idx = np.arange(hw)
    d = idx[:, None] - idx[None, :]
    band = np.zeros((hw, hw), np.float64)
    m = np.abs(d) <= k
    band[m] = g1[(d + k)[m]]
    return band.astype(np.float32)


# ----------------------------------------------------------------------------
# Chip info, VMEM accounting and tile selection
# ----------------------------------------------------------------------------
def _chip_info():
    """(physical VMEM bytes per core, number of TensorCores per chip)."""
    phys_vmem = 64 << 20           # conservative default (v7x per-core VMEM)
    num_tc = 1
    try:
        kind = (getattr(jax.devices()[0], "device_kind", "") or "").lower()
        if "v5" in kind or "v6" in kind:
            phys_vmem = 128 << 20  # v5e / v6e: 128 MiB physical VMEM, 1 TC
        if "7" in kind:            # v7x: 64 MiB per TC, 2 TCs per chip
            phys_vmem = 64 << 20
            num_tc = 2
    except Exception:              # pragma: no cover - defensive
        pass
    try:
        info = pltpu.get_tpu_info()
        cap = getattr(info, "vmem_capacity_bytes", None)
        if cap:
            phys_vmem = int(cap)
    except Exception:              # pragma: no cover - defensive
        pass
    return phys_vmem, num_tc


def _rup(a: int, m: int) -> int:
    return -(-a // m) * m


def _estimate_vmem_bytes(bt: int, tr: int, hw: int, n: int, num_classes: int) -> int:
    """Conservative VMEM footprint of one grid step (all buffers, (8,128)-padded)."""
    c = num_classes
    f = 4                                   # float32
    nl = _rup(max(n, 1), 128)               # object axis on lanes
    hwl = _rup(hw, 128)
    trs = _rup(tr, 8)
    hws = _rup(hw, 8)
    total = 0
    # pipeline blocks (double-buffered by pallas_call)
    total += 2 * bt * 8 * nl * f                                  # objects block
    total += 2 * hws * hwl * f                                    # gaussian band matrix
    total += 2 * bt * (c + 4) * trs * hwl * f                     # output block
    # in-kernel intermediates (assume co-resident)
    total += 2 * bt * hws * nl * f                                # row_hit, col_hit
    total += 2 * bt * trs * nl * f                                # row_hit_win, row_g_win
    total += bt * hws * nl * f                                    # col_g
    total += bt * (hws + trs) * hwl * f                           # broadcast G operands
    total += bt * (_rup(c, 8) + 8) * nl * f                       # w_cls, w_reg
    total += bt * (_rup(c * tr, 8) + _rup(4 * tr, 8)) * nl * f    # l_cls, l_reg
    total += bt * (c + 4) * trs * hwl * f                         # einsum results
    return int(total * 1.25) + (2 << 20)                          # fudge + compiler scratch


def _divisors(v: int):
    return [d for d in range(1, v + 1) if v % d == 0]


def _pick_tiles(b: int, hw: int, n: int, num_classes: int,
                phys_vmem: int, num_tc: int):
    """Choose (batch tile bt, spatial row tile tr, vmem budget bytes)."""
    budget = max(8 << 20, int(phys_vmem * 0.70))
    tr_cands = sorted([d for d in _divisors(hw) if d % 8 == 0], reverse=True)
    if not tr_cands:
        tr_cands = [hw]
    bt_cands = sorted([d for d in _divisors(b) if d <= 32], reverse=True)
    split_opts = (True, False) if num_tc > 1 else (False,)
    for tr in tr_cands:                    # prefer whole-image row tiles
        for require_split in split_opts:   # only force >= num_tc steps on v7x
            for bt in bt_cands:            # prefer the largest batch tile
                steps = (b // bt) * (hw // tr)
                if require_split and steps < num_tc:
                    continue
                if _estimate_vmem_bytes(bt, tr, hw, n, num_classes) <= budget:
                    return bt, tr, budget
    return 1, tr_cands[-1], budget         # last resort: smallest tiles


# ----------------------------------------------------------------------------
# Kernel
# ----------------------------------------------------------------------------
def _o2p_kernel(obj_ref, g_ref, out_ref, *, hw, tr, num_classes, smooth):
    """One grid step == `bt` batch elements x `tr` spatial rows.

    obj_ref : [bt, 6, N]             (fields on sublanes, objects on lanes)
    g_ref   : [hw, hw]               banded 1-D gaussian matrix (or identity)
    out_ref : [bt, C+4, tr, hw]      row-tile of the NCHW output
    """
    f32 = jnp.float32
    c = num_classes
    obj = obj_ref[...]                         # [bt, 6, n]
    bt = obj.shape[0]
    n = obj.shape[2]

    y = obj[:, 0:1, :]                         # [bt, 1, n]
    x = obj[:, 1:2, :]
    hsz = obj[:, 2:3, :]
    wsz = obj[:, 3:4, :]
    cls_f = obj[:, 4:5, :]
    conf = obj[:, 5:6, :]

    yfl = jnp.floor(y)
    xfl = jnp.floor(x)
    yi = yfl.astype(jnp.int32)                 # [bt, 1, n]
    xi = xfl.astype(jnp.int32)
    valid = conf == 1.0                        # is_real_object
    val = valid.astype(f32)
    dy = y - yfl
    dx = x - xfl

    # Tiny broadcasted iota (constant over batch & objects); the compares
    # broadcast it against the [bt, 1, n] center indices.  Centers outside
    # [0, hw) simply never match (OOB drop, same as the JAX reference scatter).
    pos = lax.broadcasted_iota(jnp.int32, (1, hw, 1), 1)          # [1, hw, 1]
    row_hit = (pos == yi).astype(f32)                             # [bt, hw, n]
    col_hit = (pos == xi).astype(f32)                             # [bt, hw, n]

    if tr == hw:
        row0 = 0
        row_hit_win = row_hit
    else:
        row0 = pl.multiple_of(pl.program_id(1) * tr, tr)
        pos_w = row0 + lax.broadcasted_iota(jnp.int32, (1, tr, 1), 1)
        row_hit_win = (pos_w == yi).astype(f32)                   # [bt, tr, n]

    if smooth:
        # Gaussian smoothing of the 1-D profiles as banded [hw, hw] matmuls on
        # the (otherwise idle) MXU — replaces the ks VPU compare/select passes.
        g_full = g_ref[...]                                       # [hw, hw]
        g_rows = g_full if tr == hw else g_ref[pl.ds(row0, tr), :]
        g_rows_b = jnp.broadcast_to(g_rows[None], (bt, tr, hw))   # hoisted once
        g_full_b = jnp.broadcast_to(g_full[None], (bt, hw, hw))
        row_g_win = jnp.einsum("btp,bpn->btn", g_rows_b, row_hit,
                               preferred_element_type=f32,
                               precision=_MXU_PRECISION)          # [bt, tr, n]
        col_g = jnp.einsum("bcq,bqn->bcn", g_full_b, col_hit,
                           preferred_element_type=f32,
                           precision=_MXU_PRECISION)              # [bt, hw, n]
    else:
        row_g_win = row_hit_win
        col_g = col_hit

    # Per-object, per-channel scalar weights.  Validity is folded once into the
    # class label (fake objects get class -1, which never matches).
    cvec = lax.broadcasted_iota(jnp.int32, (1, c, 1), 1)          # [1, C, 1]
    cls_i = jnp.where(valid, cls_f.astype(jnp.int32), -1)         # [bt, 1, n]
    w_cls = (cls_i == cvec).astype(f32)                           # [bt, C, n]
    jvec = lax.broadcasted_iota(jnp.int32, (1, 4, 1), 1)
    w_reg = jnp.where(jvec == 0, dy,
            jnp.where(jvec == 1, dx,
            jnp.where(jvec == 2, hsz, wsz))) * val                # [bt, 4, n]

    # lhs = (channel weight) x (row profile window), flattened to [(ch)*tr, n].
    # tr % 8 == 0 keeps these reshapes free (no VMEM relayout copy).
    # TODO(synk): for very large num_classes (e.g. 80+) loop the class matmul
    # over channel groups with a fixed-size lhs scratch instead of one big l_cls.
    l_cls = (w_cls[:, :, None, :] * row_g_win[:, None, :, :]).reshape(bt, c * tr, n)
    l_reg = (w_reg[:, :, None, :] * row_hit_win[:, None, :, :]).reshape(bt, 4 * tr, n)

    # Batched MXU matmuls contracting the object axis (minor dim of both
    # operands, the 'bqd,bkd->bqk' pattern).
    out_cls = jnp.einsum("bmn,bpn->bmp", l_cls, col_g,
                         preferred_element_type=f32,
                         precision=_MXU_PRECISION)                # [bt, C*tr, hw]
    out_reg = jnp.einsum("bmn,bpn->bmp", l_reg, col_hit,
                         preferred_element_type=f32,
                         precision=_MXU_PRECISION)                # [bt, 4*tr, hw]

    out_ref[:, :c] = out_cls.reshape(bt, c, tr, hw)
    out_ref[:, c:] = out_reg.reshape(bt, 4, tr, hw)


# ----------------------------------------------------------------------------
# Wrapper
# ----------------------------------------------------------------------------
def objects_to_points(objects, *, hw=64, num_classes=2, smooth_kernel_size=3):
    b, n, d6 = objects.shape
    assert d6 == 6
    assert hw % 8 == 0, "hw must be a multiple of 8 (TPU sublane tiling)"
    c = num_classes
    out_c = c + 4

    smooth = smooth_kernel_size != 0
    if smooth:
        g_band = _gaussian_band_matrix(hw, smooth_kernel_size)
    else:
        g_band = np.eye(hw, dtype=np.float32)   # unused by the kernel body
    g_band = jnp.asarray(g_band)

    phys_vmem, num_tc = _chip_info()
    bt, tr, vmem_budget = _pick_tiles(b, hw, n, c, phys_vmem, num_tc)
    assert b % bt == 0 and hw % tr == 0 and tr % 8 == 0

    # Put the object axis on lanes inside the kernel.
    obj_t = jnp.transpose(objects.astype(jnp.float32), (0, 2, 1))  # [B, 6, N]

    kern = functools.partial(_o2p_kernel, hw=hw, tr=tr,
                             num_classes=c, smooth=smooth)

    out = pl.pallas_call(
        kern,
        out_shape=jax.ShapeDtypeStruct((b, out_c, hw, hw), jnp.float32),
        grid_spec=pltpu.PrefetchScalarGridSpec(
            num_scalar_prefetch=0,
            grid=(b // bt, hw // tr),          # (batch tiles, spatial row tiles)
            in_specs=[
                pl.BlockSpec((bt, 6, n), lambda bi, ri: (bi, 0, 0)),
                pl.BlockSpec((hw, hw), lambda bi, ri: (0, 0)),
            ],
            out_specs=pl.BlockSpec((bt, out_c, tr, hw),
                                   lambda bi, ri: (bi, 0, ri, 0)),
        ),
        compiler_params=pltpu.CompilerParams(
            # Disjoint output blocks per step -> both axes are parallel.
            # TODO(synk): if an xprof profile shows one idle TensorCore on v7x,
            # switch the batch axis to pltpu.CORE_PARALLEL / explicit core_map.
            dimension_semantics=("parallel", "parallel"),
            vmem_limit_bytes=int(vmem_budget),
        ),
    )(obj_t, g_band)
    return out


# ----------------------------------------------------------------------------
# Pure-JAX reference (mirrors the torch forward) and self-test
# ----------------------------------------------------------------------------
def _reference(objects, *, hw, num_classes, smooth_kernel_size):
    b, n, _ = objects.shape
    c = num_classes
    heat = jnp.zeros((b, c + 4, hw, hw), jnp.float32)
    y = objects[:, :, 0]
    x = objects[:, :, 1]
    h = objects[:, :, 2]
    w = objects[:, :, 3]
    cls = objects[:, :, 4].astype(jnp.int32).reshape(-1)
    conf = objects[:, :, 5]
    val = (conf == 1.0).astype(jnp.float32).reshape(-1)
    yi = jnp.floor(y).astype(jnp.int32).reshape(-1)
    xi = jnp.floor(x).astype(jnp.int32).reshape(-1)
    bi = jnp.repeat(jnp.arange(b), n)
    dy = (y - jnp.floor(y)).reshape(-1)
    dx = (x - jnp.floor(x)).reshape(-1)
    hh = h.reshape(-1)
    ww = w.reshape(-1)

    heat = heat.at[bi, cls, yi, xi].add(val)
    if smooth_kernel_size != 0:
        g = jnp.asarray(_gaussian_2d(smooth_kernel_size), jnp.float32)
        wgt = jnp.broadcast_to(
            g[None, None], (c + 4, 1, smooth_kernel_size, smooth_kernel_size))
        pad = smooth_kernel_size // 2
        heat = lax.conv_general_dilated(
            heat, wgt, window_strides=(1, 1),
            padding=[(pad, pad), (pad, pad)],
            dimension_numbers=("NCHW", "OIHW", "NCHW"),
            feature_group_count=c + 4)
    heat = heat.at[bi, c + 0, yi, xi].add(val * dy)
    heat = heat.at[bi, c + 1, yi, xi].add(val * dx)
    heat = heat.at[bi, c + 2, yi, xi].add(val * hh)
    heat = heat.at[bi, c + 3, yi, xi].add(val * ww)
    return heat


if __name__ == "__main__":
    B, N = 2, 8
    HW, NUM_CLASSES, KSIZE = 16, 2, 3

    key = jax.random.PRNGKey(0)
    k1, k2, k3, k4 = jax.random.split(key, 4)
    yx = jax.random.uniform(k1, (B, N, 2), minval=0.0, maxval=HW - 1e-3)
    sizes = jax.random.uniform(k2, (B, N, 2), minval=1.0, maxval=8.0)
    cls = jax.random.randint(k3, (B, N, 1), 0, NUM_CLASSES).astype(jnp.float32)
    conf = (jax.random.uniform(k4, (B, N, 1)) > 0.3).astype(jnp.float32)
    objects = jnp.concatenate([yx, sizes, cls, conf], axis=-1)  # [B, N, 6]

    out = objects_to_points(
        objects, hw=HW, num_classes=NUM_CLASSES, smooth_kernel_size=KSIZE)
    out = jax.block_until_ready(out)

    ref = _reference(objects, hw=HW, num_classes=NUM_CLASSES,
                     smooth_kernel_size=KSIZE)
    np.testing.assert_allclose(np.asarray(out), np.asarray(ref),
                               rtol=1e-5, atol=1e-5)
    assert out.shape == (B, NUM_CLASSES + 4, HW, HW)
    print("KERNEL_OK")
</pallas_src>

<mosaic_0001>
module attributes {stable_mosaic.version = 11 : i64} {
  func.func @_o2p_kernel(%arg0: i32, %arg1: i32, %arg2: memref<2x6x8xf32, #tpu.memory_space<vmem>>, %arg3: memref<16x16xf32, #tpu.memory_space<vmem>>, %arg4: memref<2x6x16x16xf32, #tpu.memory_space<vmem>>) attributes {dimension_semantics = [#tpu.dimension_semantics<parallel>, #tpu.dimension_semantics<parallel>], iteration_bounds = array<i64: 1, 1>, scalar_prefetch = 0 : i64, scratch_operands = 0 : i64, tpu.core_type = #tpu.core_type<tc>, window_params = [{transform_indices = @transform_0, window_bounds = array<i64: 2, 6, 8>}, {pipeline_mode = #tpu.pipeline_mode<synchronous>, transform_indices = @transform_1, window_bounds = array<i64: 16, 16>}, {transform_indices = @transform_2, window_bounds = array<i64: 2, 6, 16, 16>}]} {
    %c0 = arith.constant 0 : index
    %c0_0 = arith.constant 0 : index
    %c0_1 = arith.constant 0 : index
    %0 = vector.load %arg2[%c0, %c0_0, %c0_1] : memref<2x6x8xf32, #tpu.memory_space<vmem>>, vector<2x6x8xf32>
    %1 = vector.extract_strided_slice %0 {offsets = [0, 0, 0], sizes = [2, 1, 8], strides = [1, 1, 1]} : vector<2x6x8xf32> to vector<2x1x8xf32>
    %2 = vector.extract_strided_slice %0 {offsets = [0, 1, 0], sizes = [2, 1, 8], strides = [1, 1, 1]} : vector<2x6x8xf32> to vector<2x1x8xf32>
    %3 = vector.extract_strided_slice %0 {offsets = [0, 2, 0], sizes = [2, 1, 8], strides = [1, 1, 1]} : vector<2x6x8xf32> to vector<2x1x8xf32>
    %4 = vector.extract_strided_slice %0 {offsets = [0, 3, 0], sizes = [2, 1, 8], strides = [1, 1, 1]} : vector<2x6x8xf32> to vector<2x1x8xf32>
    %5 = vector.extract_strided_slice %0 {offsets = [0, 4, 0], sizes = [2, 1, 8], strides = [1, 1, 1]} : vector<2x6x8xf32> to vector<2x1x8xf32>
    %6 = vector.extract_strided_slice %0 {offsets = [0, 5, 0], sizes = [2, 1, 8], strides = [1, 1, 1]} : vector<2x6x8xf32> to vector<2x1x8xf32>
    %7 = math.floor %1 : vector<2x1x8xf32>
    %8 = math.floor %2 : vector<2x1x8xf32>
    %9 = arith.fptosi %7 : vector<2x1x8xf32> to vector<2x1x8xi32>
    %10 = arith.fptosi %8 : vector<2x1x8xf32> to vector<2x1x8xi32>
    %cst = arith.constant 1.000000e+00 : f32
    %11 = vector.broadcast %cst : f32 to vector<2x1x8xf32>
    %12 = arith.cmpf oeq, %6, %11 : vector<2x1x8xf32>
    %13 = arith.extui %12 : vector<2x1x8xi1> to vector<2x1x8xi32>
    %14 = arith.sitofp %13 : vector<2x1x8xi32> to vector<2x1x8xf32>
    %15 = arith.subf %1, %7 : vector<2x1x8xf32>
    %16 = arith.subf %2, %8 : vector<2x1x8xf32>
    %17 = tpu.iota {dimensions = array<i32: 1>} : vector<1x16x1xi32>
    %18 = vector.broadcast %17 : vector<1x16x1xi32> to vector<2x16x8xi32>
    %19 = vector.broadcast %9 : vector<2x1x8xi32> to vector<2x16x8xi32>
    %20 = arith.cmpi eq, %18, %19 : vector<2x16x8xi32>
    %21 = arith.extui %20 : vector<2x16x8xi1> to vector<2x16x8xi32>
    %22 = arith.sitofp %21 : vector<2x16x8xi32> to vector<2x16x8xf32>
    %23 = vector.broadcast %17 : vector<1x16x1xi32> to vector<2x16x8xi32>
    %24 = vector.broadcast %10 : vector<2x1x8xi32> to vector<2x16x8xi32>
    %25 = arith.cmpi eq, %23, %24 : vector<2x16x8xi32>
    %26 = arith.extui %25 : vector<2x16x8xi1> to vector<2x16x8xi32>
    %27 = arith.sitofp %26 : vector<2x16x8xi32> to vector<2x16x8xf32>
    %c0_2 = arith.constant 0 : index
    %c0_3 = arith.constant 0 : index
    %28 = vector.load %arg3[%c0_2, %c0_3] : memref<16x16xf32, #tpu.memory_space<vmem>>, vector<16x16xf32>
    %29 = vector.shape_cast %28 : vector<16x16xf32> to vector<1x16x16xf32>
    %30 = vector.shape_cast %29 : vector<1x16x16xf32> to vector<1x16x16xf32>
    %31 = vector.broadcast %30 : vector<1x16x16xf32> to vector<2x16x16xf32>
    %32 = vector.shape_cast %28 : vector<16x16xf32> to vector<1x16x16xf32>
    %33 = vector.shape_cast %32 : vector<1x16x16xf32> to vector<1x16x16xf32>
    %34 = vector.broadcast %33 : vector<1x16x16xf32> to vector<2x16x16xf32>
    "tpu.trace_start"() <{level = 10 : i32, message = "btp,bpn->btn"}> : () -> ()
    %cst_4 = arith.constant dense<0.000000e+00> : vector<2x16x8xf32>
    %35 = tpu.matmul %31, %22, %cst_4 {dimension_numbers = #tpu.dot_dimension_numbers<[2], [1], [1], [2], [0, 0, 0, 1, 1, 2], [0], [0]>, precision = #tpu.contract_precision<fp32>} : vector<2x16x16xf32>, vector<2x16x8xf32>, vector<2x16x8xf32> -> vector<2x16x8xf32>
    "tpu.trace_stop"() : () -> ()
    "tpu.trace_start"() <{level = 10 : i32, message = "bcq,bqn->bcn"}> : () -> ()
    %cst_5 = arith.constant dense<0.000000e+00> : vector<2x16x8xf32>
    %36 = tpu.matmul %34, %27, %cst_5 {dimension_numbers = #tpu.dot_dimension_numbers<[2], [1], [1], [2], [0, 0, 0, 1, 1, 2], [0], [0]>, precision = #tpu.contract_precision<fp32>} : vector<2x16x16xf32>, vector<2x16x8xf32>, vector<2x16x8xf32> -> vector<2x16x8xf32>
    "tpu.trace_stop"() : () -> ()
    %37 = tpu.iota {dimensions = array<i32: 1>} : vector<1x2x1xi32>
    %38 = arith.fptosi %5 : vector<2x1x8xf32> to vector<2x1x8xi32>
    %c-1_i32 = arith.constant -1 : i32
    %39 = vector.broadcast %c-1_i32 : i32 to vector<2x1x8xi32>
    %40 = arith.select %12, %38, %39 : vector<2x1x8xi1>, vector<2x1x8xi32>
    %41 = vector.broadcast %40 : vector<2x1x8xi32> to vector<2x2x8xi32>
    %42 = vector.broadcast %37 : vector<1x2x1xi32> to vector<2x2x8xi32>
    %43 = arith.cmpi eq, %41, %42 : vector<2x2x8xi32>
    %44 = arith.extui %43 : vector<2x2x8xi1> to vector<2x2x8xi32>
    %45 = arith.sitofp %44 : vector<2x2x8xi32> to vector<2x2x8xf32>
    %46 = tpu.iota {dimensions = array<i32: 1>} : vector<1x4x1xi32>
    %c0_i32 = arith.constant 0 : i32
    %47 = vector.broadcast %c0_i32 : i32 to vector<1x4x1xi32>
    %48 = arith.cmpi eq, %46, %47 : vector<1x4x1xi32>
    %c1_i32 = arith.constant 1 : i32
    %49 = vector.broadcast %c1_i32 : i32 to vector<1x4x1xi32>
    %50 = arith.cmpi eq, %46, %49 : vector<1x4x1xi32>
    %c2_i32 = arith.constant 2 : i32
    %51 = vector.broadcast %c2_i32 : i32 to vector<1x4x1xi32>
    %52 = arith.cmpi eq, %46, %51 : vector<1x4x1xi32>
    %53 = vector.shape_cast %52 : vector<1x4x1xi1> to vector<1x4x1xi1>
    %54 = vector.broadcast %53 : vector<1x4x1xi1> to vector<2x4x8xi1>
    %55 = vector.shape_cast %3 : vector<2x1x8xf32> to vector<2x1x8xf32>
    %56 = vector.broadcast %55 : vector<2x1x8xf32> to vector<2x4x8xf32>
    %57 = vector.shape_cast %4 : vector<2x1x8xf32> to vector<2x1x8xf32>
    %58 = vector.broadcast %57 : vector<2x1x8xf32> to vector<2x4x8xf32>
    %59 = arith.select %54, %56, %58 : vector<2x4x8xi1>, vector<2x4x8xf32>
    %60 = vector.shape_cast %50 : vector<1x4x1xi1> to vector<1x4x1xi1>
    %61 = vector.broadcast %60 : vector<1x4x1xi1> to vector<2x4x8xi1>
    %62 = vector.shape_cast %16 : vector<2x1x8xf32> to vector<2x1x8xf32>
    %63 = vector.broadcast %62 : vector<2x1x8xf32> to vector<2x4x8xf32>
    %64 = arith.select %61, %63, %59 : vector<2x4x8xi1>, vector<2x4x8xf32>
    %65 = vector.shape_cast %48 : vector<1x4x1xi1> to vector<1x4x1xi1>
    %66 = vector.broadcast %65 : vector<1x4x1xi1> to vector<2x4x8xi1>
    %67 = vector.shape_cast %15 : vector<2x1x8xf32> to vector<2x1x8xf32>
    %68 = vector.broadcast %67 : vector<2x1x8xf32> to vector<2x4x8xf32>
    %69 = arith.select %66, %68, %64 : vector<2x4x8xi1>, vector<2x4x8xf32>
    %70 = vector.broadcast %14 : vector<2x1x8xf32> to vector<2x4x8xf32>
    %71 = arith.mulf %69, %70 : vector<2x4x8xf32>
    %72 = vector.shape_cast %45 : vector<2x2x8xf32> to vector<2x2x1x8xf32>
    %73 = vector.shape_cast %35 : vector<2x16x8xf32> to vector<2x1x16x8xf32>
    %74 = vector.broadcast %72 : vector<2x2x1x8xf32> to vector<2x2x16x8xf32>
    %75 = vector.broadcast %73 : vector<2x1x16x8xf32> to vector<2x2x16x8xf32>
    %76 = arith.mulf %74, %75 : vector<2x2x16x8xf32>
    %77 = vector.shape_cast %76 : vector<2x2x16x8xf32> to vector<2x32x8xf32>
    %78 = vector.shape_cast %71 : vector<2x4x8xf32> to vector<2x4x1x8xf32>
    %79 = vector.shape_cast %22 : vector<2x16x8xf32> to vector<2x1x16x8xf32>
    %80 = vector.broadcast %78 : vector<2x4x1x8xf32> to vector<2x4x16x8xf32>
    %81 = vector.broadcast %79 : vector<2x1x16x8xf32> to vector<2x4x16x8xf32>
    %82 = arith.mulf %80, %81 : vector<2x4x16x8xf32>
    %83 = vector.shape_cast %82 : vector<2x4x16x8xf32> to vector<2x64x8xf32>
    "tpu.trace_start"() <{level = 10 : i32, message = "bmn,bpn->bmp"}> : () -> ()
    %cst_6 = arith.constant dense<0.000000e+00> : vector<2x32x16xf32>
    %84 = tpu.matmul %77, %36, %cst_6 {dimension_numbers = #tpu.dot_dimension_numbers<[2], [2], [1], [1], [0, 0, 0, 1, 1, 1], [0], [0]>, precision = #tpu.contract_precision<fp32>} : vector<2x32x8xf32>, vector<2x16x8xf32>, vector<2x32x16xf32> -> vector<2x32x16xf32>
    %cst_7 = arith.constant dense<0.000000e+00> : vector<2x64x16xf32>
    %85 = tpu.matmul %83, %27, %cst_7 {dimension_numbers = #tpu.dot_dimension_numbers<[2], [2], [1], [1], [0, 0, 0, 1, 1, 1], [0], [0]>, precision = #tpu.contract_precision<fp32>} : vector<2x64x8xf32>, vector<2x16x8xf32>, vector<2x64x16xf32> -> vector<2x64x16xf32>
    "tpu.trace_stop"() : () -> ()
    %86 = vector.shape_cast %84 : vector<2x32x16xf32> to vector<2x2x16x16xf32>
    %c0_8 = arith.constant 0 : index
    %c0_9 = arith.constant 0 : index
    %c0_10 = arith.constant 0 : index
    %c0_11 = arith.constant 0 : index
    %87 = vector.load %arg4[%c0_8, %c0_9, %c0_10, %c0_11] : memref<2x6x16x16xf32, #tpu.memory_space<vmem>>, vector<2x2x16x16xf32>
    tpu.vector_store %arg4[%c0_8, %c0_9, %c0_10, %c0_11], %86 {strides = array<i32>} : memref<2x6x16x16xf32, #tpu.memory_space<vmem>>, vector<2x2x16x16xf32>,
    %88 = vector.shape_cast %85 : vector<2x64x16xf32> to vector<2x4x16x16xf32>
    %c0_12 = arith.constant 0 : index
    %c2 = arith.constant 2 : index
    %c0_13 = arith.constant 0 : index
    %c0_14 = arith.constant 0 : index
    %89 = vector.load %arg4[%c0_12, %c2, %c0_13, %c0_14] : memref<2x6x16x16xf32, #tpu.memory_space<vmem>>, vector<2x4x16x16xf32>
    tpu.vector_store %arg4[%c0_12, %c2, %c0_13, %c0_14], %88 {strides = array<i32>} : memref<2x6x16x16xf32, #tpu.memory_space<vmem>>, vector<2x4x16x16xf32>,
    return
  }
  func.func @transform_0(%arg0: i32, %arg1: i32) -> (i32, i32, i32) {
    %c0_i32 = arith.constant 0 : i32
    %c0_i32_0 = arith.constant 0 : i32
    %c0_i32_1 = arith.constant 0 : i32
    return %arg0, %c0_i32, %c0_i32_0 : i32, i32, i32
  }
  func.func @transform_1(%arg0: i32, %arg1: i32) -> (i32, i32) {
    %c0_i32 = arith.constant 0 : i32
    %c0_i32_0 = arith.constant 0 : i32
    %c0_i32_1 = arith.constant 0 : i32
    return %c0_i32, %c0_i32_0 : i32, i32
  }
  func.func @transform_2(%arg0: i32, %arg1: i32) -> (i32, i32, i32, i32) {
    %c0_i32 = arith.constant 0 : i32
    %c0_i32_0 = arith.constant 0 : i32
    %c0_i32_1 = arith.constant 0 : i32
    return %arg0, %c0_i32, %arg1, %c0_i32_0 : i32, i32, i32, i32
  }
}

</mosaic_0001>

<bundles_post_ra>
// kernel: tpu_custom_call.1
= control target key start
LH: loop header
LB: loop body
LE: loop exit
PB: predicated region body
PF: predicated region fallthrough
CT: control target
= control target key end

     0   :  { %v26_v1 = vlaneseq  ;;  %vm71_vm0 = vcmask 130048   ;;  %s7100_s0 = inlined_call_operand.vmem [shape: f32[2,6,8], index: 0, kind: input, shape index: {}]   ;;  %s7101_s1 = inlined_call_operand.vmem [shape: f32[16,16], index: 1, kind: input, shape index: {}]   ;;  %s7102_s2 = inlined_call_operand.hbm [shape: f32[2,6,16,16], index: 2, kind: output, shape index: {}]  }
   0x1   :  { %v6053_v0 = vld [vmem:[%s7100_s0] sm:$0x3f]  ;;  %v70_v3 = vld [vmem:[%s7101_s1 + $0x8] sm:$0xff] }
   0x2   :  { %v69_v2 = vld [vmem:[%s7101_s1] sm:$0xff]  ;;  %v14_v4 = vfloor.f32 %v6053_v0  ;;  %v76_v6 = vsel %vm71_vm0, %v70_v3, 0  ;;  %v6067_v7 = vld [vmem:[%s7100_s0 + $0x8] sm:$0x3f]  ;;  %v6069_v8 = vshrl.u32 %v26_v1, 7 }
   0x3   :  { %v73_v5 = vsel %vm71_vm0, %v69_v2, 0  ;;  %v6073_v10 = vand.u32 4294901760, %v76_v6  ;;  %v15_v11 = vfloor.f32 %v6067_v7 }
   0x4   :  { %v6071_v9 = vand.u32 4294901760, %v73_v5 }
   0x5   :  { %7 = vsyncpa [#allocation3], 0  ;;  %v6078_v12 = vtrunc.f32 %v14_v4  ;;  %v6081_v13 = vsub.s32 0, %v6069_v8  ;;  %v6087_v15 = vsub.f32 %v76_v6, %v6073_v10  ;;  %v6092_v17 = vadd.s32 8, %v6069_v8  ;;  %s6032_s0 = smov [#allocation2]  }
   0x6   :  { %v6084_v14 = vsub.f32 %v73_v5, %v6071_v9  ;;  %5524 = vmatprep.mubr.f32.mxu1 %v6071_v9  ;;  %v6096_v18 = vtrunc.f32 %v15_v11  ;;  %v6029_v28 = vmov 1.0   ;;  %v6030_v31 = vmov 0.0   ;;  %s5166_s1 = sshll.u32 %s6032_s0, 4  ;;  %s5167_s1 = int_to_ptr.vmem [resolvable:$true] %s5166_s1 }
   0x7   :  { %v5994_v16 = vcvt.f32.s32 %v6078_v12  ;;  %v6102_v20 = vand.u32 4294901760, %v6087_v15  ;;  %v6184_v49 = vsub.s32 1, %v6069_v8  ;;  %vm18_vm9 = vcmp.eq.f32.partialorder %v6053_v0, 1.0  ;;  %s6007_s17 = scalar_lea.vmem %s5167_s1, 3072  ;;  %p6012_p1 = scmp.lt.s32.totalorder %s5167_s1, %s5167_s1 }
   0x8   :  { %v6099_v19 = vand.u32 4294901760, %v6084_v14  ;;  %v5996_v22 = vcvt.f32.s32 %v6096_v18  ;;  %vm2108_vm10 = vcmp.eq.s32.totalorder %v6069_v8, 2  ;;  %vm2107_vm11 = vcmp.eq.s32.totalorder %v6069_v8, 1  ;;  %p6008_p0 = scmp.ne.s32.totalorder %s5167_s1, %s6007_s17  ;;  %p6013_p2 = scmp.lt.s32.totalorder %s6007_s17, %s6007_s17 }
   0x9   :  { %v32_v21 = vrot.slane %v5994_v16, %v6081_v13  ;;  %v158_v24 = vsub.f32 %v6087_v15, %v6102_v20  ;;  %v52_v52 = vrot.slane %v5994_v16, %v6184_v49  ;;  %vm2106_vm12 = vcmp.eq.s32.totalorder %v6069_v8, 0 }
   0xa   :  { %v148_v23 = vsub.f32 %v6084_v14, %v6099_v19  ;;  %v36_v27 = vrot.slane %v5996_v22, %v6081_v13  ;;  %v56_v1 = vrot.slane %v5996_v22, %v6184_v49  ;;  %v25_v39 = vsub.f32 %v6067_v7, %v15_v11  ;;  %p6014_p3 = por %p6013_p2, %p6012_p1 }
   0xb   :  { %vm6113_vm1 = vcmp.eq.s32.totalorder %v6092_v17, %v32_v21  ;;  %vm6118_vm2 = vcmp.eq.s32.totalorder %v6069_v8, %v32_v21  ;;  %v6130_v30 = vand.u32 4294901760, %v158_v24  ;;  %vm6225_vm5 = vcmp.eq.s32.totalorder %v6092_v17, %v52_v52 }
   0xc   :  { %5513 = vmatprep.subr.msk.mxu0 %vm6113_vm1, %v6029_v28  ;;  %v6128_v29 = vand.u32 4294901760, %v148_v23  ;;  %v6135_v32 = vsel %vm6113_vm1, 1.0, %v6030_v31  ;;  %v6140_v33 = vsel %vm6118_vm2, 1.0, %v6030_v31  ;;  %vm6150_vm3 = vcmp.eq.s32.totalorder %v6092_v17, %v36_v27  ;;  %p6015_p4 = pnand %p6014_p3, %p6008_p0 }
   0xd   :  { %5514 = vmatpush3.msk.msra.mxu0 %vm6113_vm1, %v6029_v28  ;;  %v195_v34 = vsub.f32 %v6135_v32, %v6135_v32  ;;  %v202_v35 = vsub.f32 %v6140_v33, %v6140_v33  ;;  %vm6162_vm4 = vcmp.eq.s32.totalorder %v6069_v8, %v36_v27  ;;  %v6170_v40 = vsel %vm6150_vm3, 1.0, %v6030_v31 }
   0xe   :  { %5515 = vmatprep.subr.msk.mxu0 %vm6118_vm2, %v6029_v28  ;;  %5517 = vmatprep.mubr.f32.mxu0 %v6128_v29  ;;  %v6176_v43 = vsel %vm6162_vm4, 1.0, %v6030_v31  ;;  %v697_v46 = vsub.f32 %v6170_v40, %v6170_v40  ;;  %vm6238_vm6 = vcmp.eq.s32.totalorder %v6069_v8, %v52_v52  ;;  %v6247_v58 = vsel %vm6225_vm5, 1.0, %v6030_v31 }
   0xf   :  { %5516 = vmatpush3.msk.msra.mxu0 %vm6118_vm2, %v6029_v28  ;;  %v196_v37 = vand.u32 4294901760, %v195_v34  ;;  %v203_v38 = vand.u32 4294901760, %v202_v35  ;;  %v704_v47 = vsub.f32 %v6176_v43, %v6176_v43  ;;  %v6252_v59 = vsel %vm6238_vm6, 1.0, %v6030_v31 }
  0x10   :  { %5518 = vmatmul.mubr.f32.vlgmr.msra.gmra.mxu0 %v6130_v30  ;;  %5527 = vmatprep.subr.mxu0 %v195_v34  ;;  %v698_v48 = vand.u32 4294901760, %v697_v46  ;;  %v1199_v60 = vsub.f32 %v6247_v58, %v6247_v58  ;;  %v1206_v61 = vsub.f32 %v6252_v59, %v6252_v59  ;;  %vm6288_vm7 = vcmp.eq.s32.totalorder %v6092_v17, %v56_v1 }
  0x11   :  { %v197_v41 = vsub.f32 %v195_v34, %v196_v37  ;;  %5528 = vmatpush3.msra.mxu0 %v195_v34  ;;  %v204_v42 = vsub.f32 %v202_v35, %v203_v38  ;;  %5531 = vmatprep.mubr.f32.mxu0 %v6084_v14  ;;  %v705_v50 = vand.u32 4294901760, %v704_v47  ;;  %v6311_v12 = vsel %vm6288_vm7, 1.0, %v6030_v31 }
  0x12   :  { %5529 = vmatprep.subr.mxu0 %v202_v35  ;;  %v699_v51 = vsub.f32 %v697_v46, %v698_v48  ;;  %v1200_v62 = vand.u32 4294901760, %v1199_v60  ;;  %v1207_v63 = vand.u32 4294901760, %v1206_v61  ;;  %vm6314_vm8 = vcmp.eq.s32.totalorder %v6069_v8, %v56_v1 }
  0x13   :  { %v198_v44 = vand.u32 4294901760, %v197_v41  ;;  %v205_v45 = vand.u32 4294901760, %v204_v42  ;;  %5530 = vmatpush3.msra.mxu0 %v202_v35  ;;  %v706_v53 = vsub.f32 %v704_v47, %v705_v50  ;;  %v6327_v18 = vsel %vm6314_vm8, 1.0, %v6030_v31 }
  0x14   :  { %5532 = vmatmul.mubr.f32.vlgmr.msra.gmra.mxu0 %v6087_v15  ;;  %5541 = vmatprep.subr.mxu0 %v196_v37  ;;  %v700_v54 = vand.u32 4294901760, %v699_v51  ;;  %v1201_v2 = vsub.f32 %v1199_v60, %v1200_v62  ;;  %v1208_v3 = vsub.f32 %v1206_v61, %v1207_v63  ;;  %v1701_v21 = vsub.f32 %v6311_v12, %v6311_v12 }
  0x15   :  { %5520 = vmatprep.subr.mxu1 %v198_v44  ;;  %5542 = vmatpush3.msra.mxu0 %v196_v37  ;;  %v707_v56 = vand.u32 4294901760, %v706_v53  ;;  %v1708_v22 = vsub.f32 %v6327_v18, %v6327_v18  ;;  %vm19_vm13 = vcmp.eq.f32.partialorder %v6067_v7, 1.0  ;;  %v2150_v42 = vrot.slane %v25_v39, %v6081_v13 }
  0x16   :  { %5521 = vmatpush3.msra.mxu1 %v198_v44  ;;  %5543 = vmatprep.subr.mxu0 %v203_v38  ;;  %v1202_v6 = vand.u32 4294901760, %v1201_v2  ;;  %v1209_v17 = vand.u32 4294901760, %v1208_v3  ;;  %v1702_v23 = vand.u32 4294901760, %v1701_v21  ;;  %v5178_v41 = vsel %vm19_vm13, 1.0, %v6030_v31 }
  0x17   :  { %5522 = vmatprep.subr.mxu1 %v205_v45  ;;  %5544 = vmatpush3.msra.mxu0 %v203_v38  ;;  %v1709_v24 = vand.u32 4294901760, %v1708_v22  ;;  %v5997_v52 = vtrunc.f32 %v6053_v0  ;;  %v6031_v57 = vmov 1966171168   ;;  %vm2343_vm15 = vcmask 64512  }
  0x18   :  { %5523 = vmatpush3.msra.mxu1 %v205_v45  ;;  %5545 = vmatprep.mubr.f32.mxu0 %v6071_v9  ;;  %v1703_v25 = vsub.f32 %v1701_v21, %v1702_v23 }
  0x19   :  { %5525 = vmatmul.mubr.f32.vlgmr.msra.gmra.mxu1 %v6073_v10  ;;  %5534 = vmatprep.subr.msk.mxu1 %vm6113_vm1, %v6029_v28  ;;  %v1710_v26 = vsub.f32 %v1708_v22, %v1709_v24  ;;  %v5998_v53 = vcvt.f32.s32 %v5997_v52 }
  0x1a   :  { %5535 = vmatpush3.msk.msra.mxu1 %vm6113_vm1, %v6029_v28  ;;  %5538 = vmatprep.mubr.f32.mxu1 %v6099_v19  ;;  %v1704_v27 = vand.u32 4294901760, %v1703_v25 }
  0x1b   :  { %5536 = vmatprep.subr.msk.mxu1 %vm6118_vm2, %v6029_v28  ;;  %5546 = vmatmul.mubr.f32.vlgmr.msra.gmra.mxu0 %v6073_v10  ;;  %v1711_v34 = vand.u32 4294901760, %v1710_v26 }
  0x1c   :  { %5537 = vmatpush3.msk.msra.mxu1 %vm6118_vm2, %v6029_v28  ;;  %5555 = vmatprep.subr.msk.mxu0 %vm6150_vm3, %v6029_v28 }
  0x1d   :  { %5539 = vmatmul.mubr.f32.vlgmr.msra.gmra.mxu1 %v6102_v20  ;;  %5548 = vmatprep.subr.msk.mxu1 %vm6113_vm1, %v6029_v28 }
  0x1e   :  { %5549 = vmatpush3.msk.msra.mxu1 %vm6113_vm1, %v6029_v28  ;;  %5556 = vmatpush3.msk.msra.mxu0 %vm6150_vm3, %v6029_v28 }
  0x1f   :  { %5550 = vmatprep.subr.msk.mxu1 %vm6118_vm2, %v6029_v28  ;;  %5557 = vmatprep.subr.msk.mxu0 %vm6162_vm4, %v6029_v28 }
  0x20   :  { %5551 = vmatpush3.msk.msra.mxu1 %vm6118_vm2, %v6029_v28  ;;  %5552 = vmatprep.mubr.f32.mxu1 %v6071_v9 }
  0x21   :  { %5558 = vmatpush3.msk.msra.mxu0 %vm6162_vm4, %v6029_v28  ;;  %5559 = vmatprep.mubr.f32.mxu0 %v6128_v29 }
  0x22   :  { %5553 = vmatmul.mubr.f32.vlgmr.msra.gmra.mxu1 %v6073_v10  ;;  %5560 = vmatmul.mubr.f32.vlgmr.msra.gmra.mxu0 %v6130_v30 }
  0x23   :  { %5562 = vmatprep.subr.mxu1 %v700_v54  ;;  %5569 = vmatprep.subr.mxu0 %v697_v46 }
  0x24   :  { %5563 = vmatpush3.msra.mxu1 %v700_v54  ;;  %5570 = vmatpush3.msra.mxu0 %v697_v46  ;;  %v2138_v46 = vrot.slane %v25_v39, %v6184_v49  ;;  %v2088_v54 = vrot.slane %v5998_v53, 7 }
  0x25   :  { %5564 = vmatprep.subr.mxu1 %v707_v56  ;;  %5571 = vmatprep.subr.mxu0 %v704_v47 }
  0x26   :  { %5565 = vmatpush3.msra.mxu1 %v707_v56  ;;  %5566 = vmatprep.mubr.f32.mxu1 %v6071_v9 }
  0x27   :  { %5572 = vmatpush3.msra.mxu0 %v704_v47  ;;  %5573 = vmatprep.mubr.f32.mxu0 %v6084_v14 }
  0x28   :  { %5567 = vmatmul.mubr.f32.vlgmr.msra.gmra.mxu1 %v6073_v10  ;;  %5574 = vmatmul.mubr.f32.vlgmr.msra.gmra.mxu0 %v6087_v15 }
  0x29   :  { %5576 = vmatprep.subr.msk.mxu1 %vm6150_vm3, %v6029_v28  ;;  %5583 = vmatprep.subr.mxu0 %v698_v48 }
  0x2a   :  { %5577 = vmatpush3.msk.msra.mxu1 %vm6150_vm3, %v6029_v28  ;;  %5584 = vmatpush3.msra.mxu0 %v698_v48 }
  0x2b   :  { %5578 = vmatprep.subr.msk.mxu1 %vm6162_vm4, %v6029_v28  ;;  %5585 = vmatprep.subr.mxu0 %v705_v50 }
  0x2c   :  { %5579 = vmatpush3.msk.msra.mxu1 %vm6162_vm4, %v6029_v28  ;;  %5580 = vmatprep.mubr.f32.mxu1 %v6099_v19 }
  0x2d   :  { %5586 = vmatpush3.msra.mxu0 %v705_v50  ;;  %5587 = vmatprep.mubr.f32.mxu0 %v6071_v9 }
  0x2e   :  { %5581 = vmatmul.mubr.f32.vlgmr.msra.gmra.mxu1 %v6102_v20  ;;  %5588 = vmatmul.mubr.f32.vlgmr.msra.gmra.mxu0 %v6073_v10 }
  0x2f   :  { %5590 = vmatprep.subr.msk.mxu1 %vm6150_vm3, %v6029_v28  ;;  %5597 = vmatprep.subr.msk.mxu0 %vm6225_vm5, %v6029_v28 }
  0x30   :  { %5591 = vmatpush3.msk.msra.mxu1 %vm6150_vm3, %v6029_v28  ;;  %5598 = vmatpush3.msk.msra.mxu0 %vm6225_vm5, %v6029_v28 }
  0x31   :  { %5592 = vmatprep.subr.msk.mxu1 %vm6162_vm4, %v6029_v28  ;;  %5599 = vmatprep.subr.msk.mxu0 %vm6238_vm6, %v6029_v28 }
  0x32   :  { %5593 = vmatpush3.msk.msra.mxu1 %vm6162_vm4, %v6029_v28  ;;  %5594 = vmatprep.mubr.f32.mxu1 %v6071_v9 }
  0x33   :  { %5600 = vmatpush3.msk.msra.mxu0 %vm6238_vm6, %v6029_v28  ;;  %5601 = vmatprep.mubr.f32.mxu0 %v6128_v29 }
  0x34   :  { %5595 = vmatmul.mubr.f32.vlgmr.msra.gmra.mxu1 %v6073_v10  ;;  %5602 = vmatmul.mubr.f32.vlgmr.msra.gmra.mxu0 %v6130_v30 }
  0x35   :  { %5604 = vmatprep.subr.mxu1 %v1202_v6  ;;  %5611 = vmatprep.subr.mxu0 %v1199_v60 }
  0x36   :  { %5605 = vmatpush3.msra.mxu1 %v1202_v6  ;;  %5612 = vmatpush3.msra.mxu0 %v1199_v60  ;;  %v2166_v60 = vunpack.c.l.s4 %v6031_v57 }
  0x37   :  { %5606 = vmatprep.subr.mxu1 %v1209_v17  ;;  %5613 = vmatprep.subr.mxu0 %v1206_v61 }
  0x38   :  { %5607 = vmatpush3.msra.mxu1 %v1209_v17  ;;  %5608 = vmatprep.mubr.f32.mxu1 %v6071_v9  ;;  %v2167_v1 = vunpack.c.0.s8 %v2166_v60 }
  0x39   :  { %5614 = vmatpush3.msra.mxu0 %v1206_v61  ;;  %5615 = vmatprep.mubr.f32.mxu0 %v6084_v14 }
  0x3a   :  { %5609 = vmatmul.mubr.f32.vlgmr.msra.gmra.mxu1 %v6073_v10  ;;  %5616 = vmatmul.mubr.f32.vlgmr.msra.gmra.mxu0 %v6087_v15  ;;  %v6465_v6 = vsub.s32 %v2167_v1, %v6069_v8 }
  0x3b   :  { %5618 = vmatprep.subr.msk.mxu1 %vm6225_vm5, %v6029_v28  ;;  %5625 = vmatprep.subr.mxu0 %v1200_v62 }
  0x3c   :  { %5619 = vmatpush3.msk.msra.mxu1 %vm6225_vm5, %v6029_v28  ;;  %5626 = vmatpush3.msra.mxu0 %v1200_v62 }
  0x3d   :  { %5620 = vmatprep.subr.msk.mxu1 %vm6238_vm6, %v6029_v28  ;;  %5627 = vmatprep.subr.mxu0 %v1207_v63 }
  0x3e   :  { %5621 = vmatpush3.msk.msra.mxu1 %vm6238_vm6, %v6029_v28  ;;  %5622 = vmatprep.mubr.f32.mxu1 %v6099_v19 }
  0x3f   :  { %5628 = vmatpush3.msra.mxu0 %v1207_v63  ;;  %5629 = vmatprep.mubr.f32.mxu0 %v6071_v9 }
  0x40   :  { %5623 = vmatmul.mubr.f32.vlgmr.msra.gmra.mxu1 %v6102_v20  ;;  %5630 = vmatmul.mubr.f32.vlgmr.msra.gmra.mxu0 %v6073_v10 }
  0x41   :  { %5632 = vmatprep.subr.msk.mxu1 %vm6225_vm5, %v6029_v28  ;;  %5636 = vmatprep.mubr.f32.mxu1 %v6071_v9 }
  0x42   :  { %5633 = vmatpush3.msk.msra.mxu1 %vm6225_vm5, %v6029_v28  ;;  %5639 = vmatprep.subr.msk.mxu0 %vm6288_vm7, %v6029_v28 }
  0x43   :  { %5634 = vmatprep.subr.msk.mxu1 %vm6238_vm6, %v6029_v28  ;;  %5640 = vmatpush3.msk.msra.mxu0 %vm6288_vm7, %v6029_v28 }
  0x44   :  { %5635 = vmatpush3.msk.msra.mxu1 %vm6238_vm6, %v6029_v28  ;;  %5641 = vmatprep.subr.msk.mxu0 %vm6314_vm8, %v6029_v28 }
  0x45   :  { %5637 = vmatmul.mubr.f32.vlgmr.msra.gmra.mxu1 %v6073_v10  ;;  %5646 = vmatprep.subr.mxu1 %v1704_v27 }
  0x46   :  { %5642 = vmatpush3.msk.msra.mxu0 %vm6314_vm8, %v6029_v28  ;;  %5643 = vmatprep.mubr.f32.mxu0 %v6128_v29 }
  0x47   :  { %5647 = vmatpush3.msra.mxu1 %v1704_v27  ;;  %5644 = vmatmul.mubr.f32.vlgmr.msra.gmra.mxu0 %v6130_v30 }
  0x48   :  { %5648 = vmatprep.subr.mxu1 %v1711_v34  ;;  %5653 = vmatprep.subr.mxu0 %v1701_v21 }
  0x49   :  { %5649 = vmatpush3.msra.mxu1 %v1711_v34  ;;  %5650 = vmatprep.mubr.f32.mxu1 %v6071_v9 }
  0x4a   :  { %5654 = vmatpush3.msra.mxu0 %v1701_v21  ;;  %5651 = vmatmul.mubr.f32.vlgmr.msra.gmra.mxu1 %v6073_v10 }
  0x4b   :  { %5655 = vmatprep.subr.mxu0 %v1708_v22  ;;  %5660 = vmatprep.subr.msk.mxu1 %vm6288_vm7, %v6029_v28 }
  0x4c   :  { %5656 = vmatpush3.msra.mxu0 %v1708_v22  ;;  %5657 = vmatprep.mubr.f32.mxu0 %v6084_v14  ;;  %v24_v14 = vsub.f32 %v6053_v0, %v14_v4 }
  0x4d   :  { %5661 = vmatpush3.msk.msra.mxu1 %vm6288_vm7, %v6029_v28  ;;  %5658 = vmatmul.mubr.f32.vlgmr.msra.gmra.mxu0 %v6087_v15  ;;  %v5177_v15 = vsel %vm18_vm9, 1.0, %v6030_v31 }
  0x4e   :  { %5662 = vmatprep.subr.msk.mxu1 %vm6314_vm8, %v6029_v28  ;;  %5667 = vmatprep.subr.mxu0 %v1702_v23  ;;  %v2146_v4 = vrot.slane %v24_v14, %v6081_v13 }
  0x4f   :  { %5663 = vmatpush3.msk.msra.mxu1 %vm6314_vm8, %v6029_v28  ;;  %5664 = vmatprep.mubr.f32.mxu1 %v6099_v19  ;;  %v6423_v19 = vsub.s32 5, %v6069_v8 }
  0x50   :  { %5668 = vmatpush3.msra.mxu0 %v1702_v23  ;;  %5665 = vmatmul.mubr.f32.vlgmr.msra.gmra.mxu1 %v6102_v20  ;;  %v2121_v20 = vsub.s32 3, %v6069_v8 }
  0x51   :  { %5669 = vmatprep.subr.mxu0 %v1709_v24  ;;  %5674 = vmatprep.subr.msk.mxu1 %vm6288_vm7, %v6029_v28  ;;  %v2160_v47 = vrot.slane %v5178_v41, %v6423_v19 }
  0x52   :  { %5670 = vmatpush3.msra.mxu0 %v1709_v24  ;;  %5671 = vmatprep.mubr.f32.mxu0 %v6071_v9  ;;  %v2122_v30 = vrot.slane %v6053_v0, %v2121_v20  ;;  %v2126_v45 = vrot.slane %v6067_v7, %v2121_v20 }
  0x53   :  { %5675 = vmatpush3.msk.msra.mxu1 %vm6288_vm7, %v6029_v28  ;;  %5672 = vmatmul.mubr.f32.vlgmr.msra.gmra.mxu0 %v6073_v10 }
  0x54   :  { %5676 = vmatprep.subr.msk.mxu1 %vm6314_vm8, %v6029_v28  ;;  %5678 = vmatprep.mubr.f32.mxu1 %v6071_v9  ;;  %v2113_v9 = vsub.s32 2, %v6069_v8 }
  0x55   :  { %5677 = vmatpush3.msk.msra.mxu1 %vm6314_vm8, %v6029_v28  ;;  %v2156_v28 = vrot.slane %v5177_v15, %v6423_v19 }
  0x56   :  { %5679 = vmatmul.mubr.f32.vlgmr.msra.gmra.mxu1 %v6073_v10  ;;  %v2134_v10 = vrot.slane %v24_v14, %v6184_v49  ;;  %v2114_v29 = vrot.slane %v6053_v0, %v2113_v9  ;;  %v2118_v44 = vrot.slane %v6067_v7, %v2113_v9  ;;  %v2090_v49 = vsel %vm18_vm9, %v2088_v54, 4294967295 }
  0x57   :  { %v2095_v62 = vrot.slane %v2090_v49, %v6423_v19 }
  0x58   :  { %v2127_v35 = vsel %vm2108_vm10, %v2114_v29, %v2122_v30  ;;  %v2128_v48 = vsel %vm2108_vm10, %v2118_v44, %v2126_v45  ;;  %v5999_v45 = vtrunc.f32 %v6067_v7 }
  0x59   :  { %v2139_v36 = vsel %vm2107_vm11, %v2134_v10, %v2127_v35  ;;  %v2140_v11 = vsel %vm2107_vm11, %v2138_v46, %v2128_v48  ;;  %vm2100_vm14 = vcmp.eq.s32.totalorder %v2095_v62, %v6069_v8 }
  0x5a   :  { %v2151_v37 = vsel %vm2106_vm12, %v2146_v4, %v2139_v36  ;;  %v2152_v50 = vsel %vm2106_vm12, %v2150_v42, %v2140_v11  ;;  %v5211_v17 = vsel %vm2100_vm14, 1.0, %v6030_v31 }
  0x5b   :  { %v6439_v38 = vmul.f32 %v2156_v28, %v2151_v37  ;;  %v6457_v51 = vmul.f32 %v2160_v47, %v2152_v50  ;;  %v2171_v24 = vrot.slane %v5211_v17, %v6465_v6 }
  0x5d   :  { %v2179_v26 = vrot.slane %v2171_v24, %v6465_v6  ;;  %v2172_v11 = vcombine.high %v2171_v24, %v2171_v24 }
  0x5f   :  { %v2212_v10 = vrot.slane %v2179_v26, %v6081_v13  ;;  %v2186_v49 = vrot.slane %v2172_v11, %v6465_v6 }
  0xd0   :  { %v5519_v55 = vpop.f32.mrf.mxu0 }
  0xd2   :  { %v151_v56 = vpop.f32.mrf.mxu0 }
  0xd4   :  { %v5533_v61 = vpop.f32.mrf.mxu0 }
  0xd6   :  { %v324_v63 = vpop.f32.mrf.mxu0 }
  0xd9   :  { %v5526_v2 = vpop.f32.mrf.mxu1 }
  0xda   :  { %v249_v20 = vadd.f32 %v5526_v2, %v5519_v55  ;;  %v6000_v55 = vcvt.f32.s32 %v5999_v45  ;;  %v2216_v2 = vrot.slane %v2186_v49, %v6081_v13 }
  0xdb   :  { %v242_v3 = vpop.f32.mrf.mxu1  ;;  %v5547_v5 = vpop.f32.mrf.mxu0 }
  0xdc   :  { %v243_v16 = vadd.f32 %v242_v3, %v151_v56  ;;  %v332_v35 = vadd.f32 %v5533_v61, %v249_v20  ;;  %v2089_v62 = vrot.slane %v6000_v55, 7 }
  0xdd   :  { %v5540_v0 = vpop.f32.mrf.mxu1  ;;  %v491_v22 = vpop.f32.mrf.mxu0 }
  0xde   :  { %v325_v21 = vadd.f32 %v324_v63, %v243_v16  ;;  %v415_v44 = vadd.f32 %v5540_v0, %v332_v35  ;;  %v2091_v16 = vsel %vm19_vm13, %v2089_v62, 4294967295 }
  0xdf   :  { %v406_v23 = vpop.f32.mrf.mxu1 }
  0xe0   :  { %v407_v25 = vadd.f32 %v406_v23, %v325_v21  ;;  %v498_v54 = vadd.f32 %v5547_v5, %v415_v44  ;;  %v2099_v23 = vrot.slane %v2091_v16, %v6423_v19 }
  0xe2   :  { %v492_v27 = vadd.f32 %v491_v22, %v407_v25  ;;  %v5554_v34 = vpop.f32.mrf.mxu1  ;;  %v5561_v14 = vpop.f32.mrf.mxu0  ;;  %vm2101_vm1 = vcmp.eq.s32.totalorder %v2099_v23, %v6069_v8 }
  0xe3   :  { %v577_v61 = vadd.f32 %v5554_v34, %v498_v54 }
  0xe4   :  { %v570_v15 = vpop.f32.mrf.mxu1  ;;  %v653_v9 = vpop.f32.mrf.mxu0 }
  0xe5   :  { %v571_v28 = vadd.f32 %v570_v15, %v492_v27  ;;  %v2230_v3 = vmul.f32 %v2212_v10, %v577_v61  ;;  %v2232_v22 = vmul.f32 %v2216_v2, %v577_v61 }
  0xe7   :  { %v2229_v4 = vmul.f32 %v2212_v10, %v571_v28  ;;  %v2231_v0 = vmul.f32 %v2216_v2, %v571_v28  ;;  %v2348_v26 = vsel %vm2343_vm15, %v2230_v3, 0  ;;  %v2354_v7 = vsel %vm2343_vm15, %v2232_v22, 0 }
  0xe8   :  { %v5568_v29 = vpop.f32.mrf.mxu1  ;;  %v5575_v30 = vpop.f32.mrf.mxu0 }
  0xe9   :  { %v2345_v36 = vsel %vm2343_vm15, %v2229_v4, 0  ;;  %v2351_v20 = vsel %vm2343_vm15, %v2231_v0, 0  ;;  %v6497_v4 = vand.u32 4294901760, %v2348_v26  ;;  %v751_v35 = vadd.f32 %v5568_v29, %v5561_v14 }
  0xea   :  { %v6472_v37 = vand.u32 4294901760, %v2345_v36  ;;  %v744_v39 = vpop.f32.mrf.mxu1  ;;  %v826_v41 = vpop.f32.mrf.mxu0  ;;  %v6500_v45 = vand.u32 4294901760, %v2351_v20 }
  0xeb   :  { %v745_v27 = vadd.f32 %v744_v39, %v653_v9  ;;  %v6502_v9 = vand.u32 4294901760, %v2354_v7  ;;  %v5212_v39 = vsel %vm2101_vm1, 1.0, %v6030_v31  ;;  %v6506_v55 = vsub.f32 %v2348_v26, %v6497_v4 }
  0xec   :  { %v6475_v42 = vsub.f32 %v2345_v36, %v6472_v37  ;;  %5695 = vmatprep.mubr.f32.mxu1 %v6472_v37 }
  0xed   :  { %v827_v19 = vadd.f32 %v826_v41, %v745_v27  ;;  %v6509_v41 = vsub.f32 %v2351_v20, %v6500_v45  ;;  %v6513_v62 = vsub.f32 %v2354_v7, %v6502_v9 }
  0xee   :  { %v5582_v46 = vpop.f32.mrf.mxu1  ;;  %v6479_v47 = vpop.f32.mrf.mxu0  ;;  %v2431_v48 = vand.u32 4294901760, %v6475_v42 }
  0xef   :  { %v2451_v23 = vand.u32 4294901760, %v6509_v41 }
  0xf0   :  { %v908_v50 = vpop.f32.mrf.mxu1  ;;  %v993_v52 = vpop.f32.mrf.mxu0  ;;  %v2432_v53 = vsub.f32 %v6475_v42, %v2431_v48 }
  0xf1   :  { %v909_v29 = vadd.f32 %v908_v50, %v827_v19 }
  0xf2   :  { %v2433_v56 = vand.u32 4294901760, %v2432_v53 }
  0xf3   :  { %v994_v50 = vadd.f32 %v993_v52, %v909_v29 }
  0xf4   :  { %v6486_v57 = vpop.f32.mrf.mxu1  ;;  %v5603_v60 = vpop.f32.mrf.mxu0  ;;  %5685 = vmatprep.mubr.f32.mxu0 %v2433_v56  ;;  %v834_v56 = vadd.f32 %v5575_v30, %v751_v35  ;;  %v2441_v30 = vand.u32 4294901760, %v6506_v55 }
  0xf6   :  { %v6488_v63 = vpop.f32.mrf.mxu1  ;;  %v1155_v1 = vpop.f32.mrf.mxu0  ;;  %v917_v2 = vadd.f32 %v5582_v46, %v834_v56 }
  0xf7   :  { %v1073_v20 = vadd.f32 %v6488_v63, %v994_v50 }
  0xf8   :  { %v1000_v52 = vadd.f32 %v6479_v47, %v917_v2 }
  0xfa   :  { %v5610_v5 = vpop.f32.mrf.mxu1  ;;  %v5617_v17 = vpop.f32.mrf.mxu0 }
  0xfb   :  { %v1253_v21 = vadd.f32 %v5610_v5, %v5603_v60  ;;  %v2193_v60 = vrot.slane %v5212_v39, %v6465_v6 }
  0xfc   :  { %v1246_v24 = vpop.f32.mrf.mxu1  ;;  %v1328_v25 = vpop.f32.mrf.mxu0 }
  0xfd   :  { %v1336_v34 = vadd.f32 %v5617_v17, %v1253_v21  ;;  %v1247_v15 = vadd.f32 %v1246_v24, %v1155_v1  ;;  %v2194_v0 = vcombine.high %v2193_v60, %v2193_v60  ;;  %v2201_v24 = vrot.slane %v2193_v60, %v6465_v6 }
  0xff   :  { %v1329_v10 = vadd.f32 %v1328_v25, %v1247_v15  ;;  %v2461_v15 = vand.u32 4294901760, %v6513_v62  ;;  %v2208_v19 = vrot.slane %v2194_v0, %v6465_v6 }
 0x100   :  { %v5624_v28 = vpop.f32.mrf.mxu1  ;;  %v5631_v36 = vpop.f32.mrf.mxu0 }
 0x101   :  { %v1419_v44 = vadd.f32 %v5624_v28, %v1336_v34  ;;  %v2442_v34 = vsub.f32 %v6506_v55, %v2441_v30  ;;  %v2462_v29 = vsub.f32 %v6513_v62, %v2461_v15 }
 0x102   :  { %v1410_v11 = vpop.f32.mrf.mxu1  ;;  %v1495_v14 = vpop.f32.mrf.mxu0 }
 0x103   :  { %v1502_v53 = vadd.f32 %v5631_v36, %v1419_v44  ;;  %v1411_v54 = vadd.f32 %v1410_v11, %v1329_v10  ;;  %v2452_v36 = vsub.f32 %v6509_v41, %v2451_v23  ;;  %v2220_v44 = vrot.slane %v2201_v24, %v6081_v13 }
 0x105   :  { %v1496_v8 = vadd.f32 %v1495_v14, %v1411_v54  ;;  %v5638_v49 = vpop.f32.mrf.mxu1  ;;  %v2443_v14 = vand.u32 4294901760, %v2442_v34 }
 0x106   :  { %v1581_v61 = vadd.f32 %v5638_v49, %v1502_v53  ;;  %v1079_v53 = vadd.f32 %v6486_v57, %v1000_v52 }
 0x107   :  { %v1574_v31 = vpop.f32.mrf.mxu1  ;;  %v5645_v1 = vpop.f32.mrf.mxu0 }
 0x108   :  { %v2360_v3 = vsel %vm2343_vm15, %v1581_v61, 0  ;;  %v1575_v16 = vadd.f32 %v1574_v31, %v1496_v8  ;;  %v2233_v8 = vmul.f32 %v2220_v44, %v1073_v20 }
 0x109   :  { %v6517_v5 = vand.u32 4294901760, %v2360_v3  ;;  %v1657_v17 = vpop.f32.mrf.mxu0 }
 0x10a   :  { %v2357_v21 = vsel %vm2343_vm15, %v1575_v16, 0  ;;  %v5652_v22 = vpop.f32.mrf.mxu1  ;;  %v2224_v16 = vrot.slane %v2208_v19, %v6081_v13  ;;  %v2951_v0 = vsel %vm2343_vm15, %v2233_v8, 0 }
 0x10b   :  { %v2499_v25 = vsub.f32 %v2360_v3, %v6517_v5  ;;  %v6523_v46 = vand.u32 4294901760, %v2357_v21  ;;  %5681 = vmatprep.subr.mxu0 %v6517_v5  ;;  %v1755_v26 = vadd.f32 %v5652_v22, %v5645_v1  ;;  %v2453_v1 = vand.u32 4294901760, %v2452_v36 }
 0x10c   :  { %5682 = vmatpush3.xpose.msra.mxu0 %v6517_v5  ;;  %v1748_v27 = vpop.f32.mrf.mxu1  ;;  %v2463_v22 = vand.u32 4294901760, %v2462_v29  ;;  %v2235_v24 = vmul.f32 %v2224_v16, %v1073_v20  ;;  %v6553_v34 = vand.u32 4294901760, %v2951_v0 }
 0x10d   :  { %v2506_v10 = vsub.f32 %v2357_v21, %v6523_v46  ;;  %5683 = vmatprep.subr.mxu0 %v6523_v46  ;;  %v1749_v7 = vadd.f32 %v1748_v27, %v1657_v17  ;;  %v5659_v35 = vpop.f32.mrf.mxu0  ;;  %v6535_v28 = vand.u32 4294901760, %v2499_v25  ;;  %v2234_v17 = vmul.f32 %v2220_v44, %v1079_v53 }
 0x10e   :  { %v1838_v47 = vadd.f32 %v5659_v35, %v1755_v26  ;;  %v2236_v35 = vmul.f32 %v2224_v16, %v1079_v53  ;;  %v2957_v20 = vsel %vm2343_vm15, %v2235_v24, 0 }
 0x10f   :  { %v1830_v11 = vpop.f32.mrf.mxu0  ;;  %v2501_v63 = vsub.f32 %v2499_v25, %v6535_v28  ;;  %v6543_v39 = vand.u32 4294901760, %v2506_v10  ;;  %v6573_v53 = vand.u32 4294901760, %v2957_v20 }
 0x110   :  { %5684 = vmatpush3.xpose.msra.mxu0 %v6523_v46  ;;  %v1831_v54 = vadd.f32 %v1830_v11, %v1749_v7  ;;  %v5666_v56 = vpop.f32.mrf.mxu1 }
 0x111   :  { %v1921_v49 = vadd.f32 %v5666_v56, %v1838_v47  ;;  %5701 = vmatprep.subr.mxu0 %v2499_v25  ;;  %v2502_v60 = vand.u32 4294901760, %v2501_v63  ;;  %v2508_v61 = vsub.f32 %v2506_v10, %v6543_v39  ;;  %v2954_v47 = vsel %vm2343_vm15, %v2234_v17, 0 }
 0x112   :  { %v1912_v31 = vpop.f32.mrf.mxu1  ;;  %v6565_v11 = vand.u32 4294901760, %v2954_v47  ;;  %v6568_v63 = vsub.f32 %v2951_v0, %v6553_v34 }
 0x113   :  { %v1913_v2 = vadd.f32 %v1912_v31, %v1831_v54  ;;  %v5673_v3 = vpop.f32.mrf.mxu0  ;;  %5686 = vmatmul.mubr.f32.vlgmr.msra.gmra.mxu0 %v2443_v14  ;;  %5691 = vmatprep.subr.mxu1 %v2502_v60  ;;  %v2509_v57 = vand.u32 4294901760, %v2508_v61  ;;  %v2245_v14 = vrot.slane %v6439_v38, %v6465_v6 }
 0x114   :  { %v2004_v50 = vadd.f32 %v5673_v3, %v1921_v49  ;;  %5688 = vmatprep.mubr.f32.mxu0 %v2453_v1  ;;  %5692 = vmatpush3.xpose.msra.mxu1 %v2502_v60  ;;  %v6589_v29 = vsub.f32 %v2954_v47, %v6565_v11  ;;  %v6598_v49 = vsub.f32 %v2957_v20, %v6573_v53 }
 0x115   :  { %5702 = vmatpush3.xpose.msra.mxu0 %v2499_v25  ;;  %v1997_v21 = vpop.f32.mrf.mxu0  ;;  %5693 = vmatprep.subr.mxu1 %v2509_v57 }
 0x116   :  { %v1998_v26 = vadd.f32 %v1997_v21, %v1913_v2  ;;  %v5680_v52 = vpop.f32.mrf.mxu1  ;;  %5703 = vmatprep.subr.mxu0 %v2506_v10  ;;  %v3047_v61 = vand.u32 4294901760, %v6589_v29  ;;  %v3057_v2 = vand.u32 4294901760, %v6598_v49 }
 0x117   :  { %v2083_v27 = vadd.f32 %v5680_v52, %v2004_v50  ;;  %5689 = vmatmul.mubr.f32.gmra.mxu0 %v2463_v22 }
 0x118   :  { %v2076_v7 = vpop.f32.mrf.mxu1  ;;  %5694 = vmatpush3.xpose.msra.mxu1 %v2509_v57  ;;  %5705 = vmatprep.mubr.f32.mxu0 %v6475_v42  ;;  %v2253_v42 = vrot.slane %v2245_v14, %v6465_v6  ;;  %v3058_v16 = vsub.f32 %v6598_v49, %v3057_v2 }
 0x119   :  { %v2966_v25 = vsel %vm2343_vm15, %v2083_v27, 0  ;;  %v2077_v36 = vadd.f32 %v2076_v7, %v1998_v26  ;;  %5704 = vmatpush3.xpose.msra.mxu0 %v2506_v10  ;;  %5711 = vmatprep.subr.mxu1 %v6517_v5  ;;  %v2960_v10 = vsel %vm2343_vm15, %v2236_v35, 0  ;;  %v3584_v35 = vsel %vm2343_vm15, %v6247_v58, 0 }
 0x11a   :  { %v6560_v19 = vand.u32 4294901760, %v2966_v25  ;;  %5721 = vmatprep.subr.mxu0 %v6535_v28  ;;  %v6591_v8 = vand.u32 4294901760, %v2960_v10  ;;  %v2261_v17 = vcombine.high %v2253_v42, %v2253_v42 }
 0x11b   :  { %v2963_v44 = vsel %vm2343_vm15, %v2077_v36, 0  ;;  %5696 = vmatmul.mubr.f32.vlgmr.msra.gmra.mxu1 %v6497_v4 }
 0x11c   :  { %5706 = vmatmul.mubr.f32.vlgmr.msra.gmra.mxu0 %v6506_v55  ;;  %5698 = vmatprep.mubr.f32.mxu1 %v6500_v45  ;;  %v6576_v54 = vsub.f32 %v2966_v25, %v6560_v19  ;;  %v6580_v56 = vand.u32 4294901760, %v2963_v44  ;;  %v6614_v31 = vsub.f32 %v2960_v10, %v6591_v8  ;;  %v2298_v52 = vrot.slane %v2261_v17, %v6081_v13 }
 0x11d   :  { %5708 = vmatprep.mubr.f32.mxu0 %v6509_v41  ;;  %5712 = vmatpush3.xpose.msra.mxu1 %v6517_v5  ;;  %v6686_v10 = vsub.f32 %v3584_v35, %v3584_v35 }
 0x11e   :  { %5722 = vmatpush3.xpose.msra.mxu0 %v6535_v28  ;;  %5713 = vmatprep.subr.mxu1 %v6523_v46  ;;  %v3037_v28 = vand.u32 4294901760, %v6568_v63  ;;  %v6603_v38 = vand.u32 4294901760, %v6576_v54  ;;  %v6606_v60 = vsub.f32 %v2963_v44, %v6580_v56  ;;  %v3067_v3 = vand.u32 4294901760, %v6614_v31 }
 0x11f   :  { %5723 = vmatprep.subr.mxu0 %v6543_v39  ;;  %5699 = vmatmul.mubr.f32.gmra.mxu1 %v6502_v9  ;;  %v2331_v36 = vmul.f32 %v6140_v33, %v2298_v52 }
 0x120   :  { %5709 = vmatmul.mubr.f32.gmra.mxu0 %v6513_v62  ;;  %5715 = vmatprep.mubr.f32.mxu1 %v2431_v48  ;;  %v2246_v48 = vcombine.high %v2245_v14, %v2245_v14  ;;  %v3038_v1 = vsub.f32 %v6568_v63, %v3037_v28  ;;  %v6630_v55 = vand.u32 4294901760, %v6606_v60  ;;  %v3068_v0 = vsub.f32 %v6614_v31, %v3067_v3 }
 0x121   :  { %5714 = vmatpush3.xpose.msra.mxu1 %v6523_v46  ;;  %5725 = vmatprep.mubr.f32.mxu0 %v6472_v37 }
 0x122   :  { %5724 = vmatpush3.xpose.msra.mxu0 %v6543_v39  ;;  %5731 = vmatprep.subr.mxu1 %v6517_v5  ;;  %v3107_v39 = vsub.f32 %v6576_v54, %v6603_v38  ;;  %v2260_v41 = vrot.slane %v2246_v48, %v6465_v6  ;;  %v3114_v50 = vsub.f32 %v6606_v60, %v6630_v55 }
 0x123   :  { %5741 = vmatprep.subr.mxu0 %v6560_v19 }
 0x124   :  { %5716 = vmatmul.mubr.f32.vlgmr.msra.gmra.mxu1 %v2441_v30  ;;  %v2290_v30 = vrot.slane %v2253_v42, %v6081_v13  ;;  %v3108_v57 = vand.u32 4294901760, %v3107_v39  ;;  %v3115_v22 = vand.u32 4294901760, %v3114_v50  ;;  %v2262_v27 = vcombine.high %v2260_v41, %v2260_v41 }
 0x125   :  { %5726 = vmatmul.mubr.f32.vlgmr.msra.gmra.mxu0 %v6497_v4  ;;  %5718 = vmatprep.mubr.f32.mxu1 %v2451_v23  ;;  %v3048_v23 = vsub.f32 %v6589_v29, %v3047_v61  ;;  %v2332_v42 = vmul.f32 %v6135_v32, %v2298_v52  ;;  %v3581_v39 = vsel %vm2343_vm15, %v6252_v59, 0 }
 0x126   :  { %5728 = vmatprep.mubr.f32.mxu0 %v6500_v45  ;;  %5732 = vmatpush3.xpose.msra.mxu1 %v6517_v5  ;;  %v3039_v5 = vand.u32 4294901760, %v3038_v1  ;;  %v2327_v62 = vmul.f32 %v6140_v33, %v2290_v30  ;;  %v2328_v21 = vmul.f32 %v6135_v32, %v2290_v30 }
 0x127   :  { %5742 = vmatpush3.xpose.msra.mxu0 %v6560_v19  ;;  %5733 = vmatprep.subr.mxu1 %v6523_v46 }
 0x128   :  { %5743 = vmatprep.subr.mxu0 %v6580_v56  ;;  %5719 = vmatmul.mubr.f32.gmra.mxu1 %v2461_v15  ;;  %v2294_v15 = vrot.slane %v2260_v41, %v6081_v13  ;;  %v3557_v24 = vsel %vm2343_vm15, %v2327_v62, 0  ;;  %v6708_v41 = vand.u32 4294901760, %v6686_v10 }
 0x129   :  { %5729 = vmatmul.mubr.f32.gmra.mxu0 %v6502_v9  ;;  %5735 = vmatprep.mubr.f32.mxu1 %v6472_v37  ;;  %v3049_v37 = vand.u32 4294901760, %v3048_v23  ;;  %v6667_v7 = vand.u32 4294901760, %v3557_v24 }
 0x12a   :  { %5734 = vmatpush3.xpose.msra.mxu1 %v6523_v46  ;;  %5745 = vmatprep.mubr.f32.mxu0 %v3039_v5  ;;  %v3059_v46 = vand.u32 4294901760, %v3058_v16  ;;  %v2329_v26 = vmul.f32 %v6140_v33, %v2294_v15  ;;  %v2330_v47 = vmul.f32 %v6135_v32, %v2294_v15  ;;  %v6724_v16 = vsub.f32 %v3581_v39, %v3581_v39 }
 0x12b   :  { %5744 = vmatpush3.xpose.msra.mxu0 %v6580_v56  ;;  %5751 = vmatprep.subr.mxu1 %v3108_v57  ;;  %v6684_v44 = vsub.f32 %v3557_v24, %v6667_v7 }
 0x12c   :  { %5761 = vmatprep.subr.mxu0 %v6576_v54  ;;  %v3563_v25 = vsel %vm2343_vm15, %v2329_v26, 0  ;;  %v3566_v14 = vsel %vm2343_vm15, %v2330_v47, 0 }
 0x12d   :  { %5736 = vmatmul.mubr.f32.vlgmr.msra.gmra.mxu1 %v6497_v4  ;;  %v3069_v4 = vand.u32 4294901760, %v3068_v0  ;;  %v3655_v30 = vand.u32 4294901760, %v6684_v44 }
 0x12e   :  { %5746 = vmatmul.mubr.f32.vlgmr.msra.gmra.mxu0 %v3049_v37  ;;  %5738 = vmatprep.mubr.f32.mxu1 %v6500_v45  ;;  %v3560_v45 = vsel %vm2343_vm15, %v2328_v21, 0 }
 0x12f   :  { %5748 = vmatprep.mubr.f32.mxu0 %v3059_v46  ;;  %5752 = vmatpush3.xpose.msra.mxu1 %v3108_v57  ;;  %v6680_v20 = vand.u32 4294901760, %v3560_v45  ;;  %v6754_v46 = vand.u32 4294901760, %v6724_v16 }
 0x130   :  { %5762 = vmatpush3.xpose.msra.mxu0 %v6576_v54  ;;  %5753 = vmatprep.subr.mxu1 %v3115_v22  ;;  %v6689_v54 = vand.u32 4294901760, %v3563_v25 }
 0x131   :  { %5763 = vmatprep.subr.mxu0 %v6606_v60  ;;  %5739 = vmatmul.mubr.f32.gmra.mxu1 %v6502_v9  ;;  %v2302_v9 = vrot.slane %v2262_v27, %v6081_v13  ;;  %v6700_v1 = vsub.f32 %v3560_v45, %v6680_v20  ;;  %v3772_v52 = vsub.f32 %v6724_v16, %v6754_v46 }
 0x132   :  { %5749 = vmatmul.mubr.f32.gmra.mxu0 %v3069_v4  ;;  %5755 = vmatprep.mubr.f32.mxu1 %v6553_v34  ;;  %v6715_v23 = vsub.f32 %v3563_v25, %v6689_v54 }
 0x133   :  { %5754 = vmatpush3.xpose.msra.mxu1 %v3115_v22  ;;  %5765 = vmatprep.mubr.f32.mxu0 %v6568_v63  ;;  %v2333_v48 = vmul.f32 %v6140_v33, %v2302_v9  ;;  %v6710_v33 = vand.u32 4294901760, %v3566_v14  ;;  %v2334_v57 = vmul.f32 %v6135_v32, %v2302_v9  ;;  %v3665_v62 = vand.u32 4294901760, %v6700_v1 }
 0x134   :  { %5764 = vmatpush3.xpose.msra.mxu0 %v6606_v60  ;;  %5771 = vmatprep.subr.mxu1 %v6560_v19  ;;  %v3569_v60 = vsel %vm2343_vm15, %v2331_v36, 0  ;;  %v3656_v32 = vsub.f32 %v6684_v44, %v3655_v30  ;;  %v3765_v63 = vsub.f32 %v6686_v10, %v6708_v41  ;;  %v3675_v17 = vand.u32 4294901760, %v6715_v23 }
 0x135   :  { %5781 = vmatprep.subr.mxu0 %v6603_v38  ;;  %v6717_v5 = vand.u32 4294901760, %v3569_v60  ;;  %v3575_v50 = vsel %vm2343_vm15, %v2333_v48, 0  ;;  %v3578_v0 = vsel %vm2343_vm15, %v2334_v57, 0  ;;  %v3666_v21 = vsub.f32 %v6700_v1, %v3665_v62 }
 0x136   :  { %5756 = vmatmul.mubr.f32.vlgmr.msra.gmra.mxu1 %v6565_v11  ;;  %v6748_v37 = vand.u32 4294901760, %v3575_v50  ;;  %v3657_v22 = vand.u32 4294901760, %v3656_v32  ;;  %v6768_v24 = vand.u32 4294901760, %v3578_v0  ;;  %v3773_v35 = vand.u32 4294901760, %v3772_v52 }
 0x137   :  { %5766 = vmatmul.mubr.f32.vlgmr.msra.gmra.mxu0 %v6589_v29  ;;  %5758 = vmatprep.mubr.f32.mxu1 %v6573_v53  ;;  %v3667_v27 = vand.u32 4294901760, %v3666_v21  ;;  %v4374_v48 = vsel %vm2343_vm15, %v6311_v12, 0 }
 0x138   :  { %5768 = vmatprep.mubr.f32.mxu0 %v6598_v49  ;;  %5772 = vmatpush3.xpose.msra.mxu1 %v6560_v19  ;;  %v3766_v49 = vand.u32 4294901760, %v3765_v63  ;;  %v6778_v26 = vsub.f32 %v3575_v50, %v6748_v37  ;;  %v6843_v57 = vsub.f32 %v4374_v48, %v4374_v48 }
 0x139   :  { %5782 = vmatpush3.xpose.msra.mxu0 %v6603_v38  ;;  %5773 = vmatprep.subr.mxu1 %v6580_v56  ;;  %v3572_v38 = vsel %vm2343_vm15, %v2332_v42, 0 }
 0x13a   :  { %5783 = vmatprep.subr.mxu0 %v6630_v55  ;;  %5759 = vmatmul.mubr.f32.gmra.mxu1 %v6591_v8  ;;  %v6740_v15 = vand.u32 4294901760, %v3572_v38  ;;  %v6854_v32 = vand.u32 4294901760, %v6843_v57 }
 0x13b   :  { %5769 = vmatmul.mubr.f32.gmra.mxu0 %v6614_v31  ;;  %5775 = vmatprep.mubr.f32.mxu1 %v3037_v28  ;;  %v6738_v28 = vsub.f32 %v3566_v14, %v6710_v33 }
 0x13c   :  { %5774 = vmatpush3.xpose.msra.mxu1 %v6580_v56  ;;  %5785 = vmatprep.mubr.f32.mxu0 %v6553_v34 }
 0x13d   :  { %5784 = vmatpush3.xpose.msra.mxu0 %v6630_v55  ;;  %5791 = vmatprep.subr.mxu1 %v6560_v19  ;;  %v6746_v55 = vsub.f32 %v3569_v60, %v6717_v5  ;;  %v3685_v29 = vand.u32 4294901760, %v6738_v28  ;;  %v2269_v60 = vrot.slane %v6457_v51, %v6465_v6 }
 0x13e   :  { %5801 = vmatprep.subr.msk.mxu0 %vm2343_vm15, %v6247_v58 }
 0x13f   :  { %5776 = vmatmul.mubr.f32.vlgmr.msra.gmra.mxu1 %v3047_v61  ;;  %v6766_v61 = vsub.f32 %v3572_v38, %v6740_v15  ;;  %v3686_v4 = vsub.f32 %v6738_v28, %v3685_v29  ;;  %v2270_v51 = vcombine.high %v2269_v60, %v2269_v60 }
 0x140   :  { %5786 = vmatmul.mubr.f32.vlgmr.msra.gmra.mxu0 %v6565_v11  ;;  %5778 = vmatprep.mubr.f32.mxu1 %v3057_v2  ;;  %v3676_v2 = vsub.f32 %v6715_v23, %v3675_v17 }
 0x141   :  { %5788 = vmatprep.mubr.f32.mxu0 %v6573_v53  ;;  %5792 = vmatpush3.xpose.msra.mxu1 %v6560_v19  ;;  %v3695_v19 = vand.u32 4294901760, %v6746_v55  ;;  %v3705_v31 = vand.u32 4294901760, %v6766_v61  ;;  %v3687_v47 = vand.u32 4294901760, %v3686_v4  ;;  %v2284_v38 = vrot.slane %v2270_v51, %v6465_v6 }
 0x142   :  { %5802 = vmatpush3.xpose.msk.msra.mxu0 %vm2343_vm15, %v6247_v58  ;;  %5793 = vmatprep.subr.mxu1 %v6580_v56  ;;  %v3677_v45 = vand.u32 4294901760, %v3676_v2 }
 0x143   :  { %5779 = vmatmul.mubr.f32.gmra.mxu1 %v3067_v3  ;;  %5803 = vmatprep.subr.msk.mxu0 %vm2343_vm15, %v6252_v59  ;;  %v6794_v3 = vsub.f32 %v3578_v0, %v6768_v24  ;;  %v3706_v25 = vsub.f32 %v6766_v61, %v3705_v31  ;;  %v2310_v50 = vrot.slane %v2284_v38, %v6081_v13 }
 0x144   :  { %5789 = vmatmul.mubr.f32.gmra.mxu0 %v6591_v8  ;;  %5795 = vmatprep.mubr.f32.mxu1 %v6553_v34  ;;  %v3696_v34 = vsub.f32 %v6746_v55, %v3695_v19 }
 0x145   :  { %5794 = vmatpush3.xpose.msra.mxu1 %v6580_v56  ;;  %5805 = vmatprep.mubr.f32.mxu0 %v3657_v22  ;;  %v3715_v56 = vand.u32 4294901760, %v6778_v26  ;;  %v3725_v36 = vand.u32 4294901760, %v6794_v3  ;;  %v2337_v0 = vmul.f32 %v6176_v43, %v2310_v50  ;;  %v2286_v22 = vcombine.high %v2284_v38, %v2284_v38 }
 0x146   :  { %5804 = vmatpush3.xpose.msk.msra.mxu0 %vm2343_vm15, %v6252_v59  ;;  %5817 = vmatprep.subr.mxu1 %v3766_v49  ;;  %v3697_v9 = vand.u32 4294901760, %v3696_v34  ;;  %v2338_v2 = vmul.f32 %v6170_v40, %v2310_v50 }
 0x147   :  { %5833 = vmatprep.subr.mxu0 %v6686_v10  ;;  %v3716_v14 = vsub.f32 %v6778_v26, %v3715_v56 }
 0x148   :  { %5796 = vmatmul.mubr.f32.vlgmr.msra.gmra.mxu1 %v6565_v11  ;;  %v3707_v11 = vand.u32 4294901760, %v3706_v25 }
 0x149   :  { %5806 = vmatmul.mubr.f32.vlgmr.msra.gmra.mxu0 %v3667_v27  ;;  %5798 = vmatprep.mubr.f32.mxu1 %v6573_v53  ;;  %v3726_v53 = vsub.f32 %v6794_v3, %v3725_v36  ;;  %v3717_v42 = vand.u32 4294901760, %v3716_v14 }
 0x14a   :  { %5818 = vmatpush3.xpose.msra.mxu1 %v3766_v49  ;;  %5808 = vmatprep.mubr.f32.mxu0 %v3677_v45  ;;  %v4555_v49 = vsub.f32 %v6843_v57, %v6854_v32 }
 0x14b   :  { %5819 = vmatprep.subr.mxu1 %v3773_v35  ;;  %5834 = vmatpush3.xpose.msra.mxu0 %v6686_v10  ;;  %v2277_v10 = vrot.slane %v2269_v60, %v6465_v6 }
 0x14c   :  { %5799 = vmatmul.mubr.f32.gmra.mxu1 %v6591_v8  ;;  %5835 = vmatprep.subr.mxu0 %v6724_v16  ;;  %v3727_v8 = vand.u32 4294901760, %v3726_v53  ;;  %v4556_v27 = vand.u32 4294901760, %v4555_v49 }
 0x14d   :  { %5809 = vmatmul.mubr.f32.gmra.mxu0 %v3687_v47  ;;  %5821 = vmatprep.mubr.f32.mxu1 %v6667_v7  ;;  %v2306_v39 = vrot.slane %v2277_v10, %v6081_v13  ;;  %v2285_v6 = vcombine.high %v2277_v10, %v2277_v10 }
 0x14e   :  { %5820 = vmatpush3.xpose.msra.mxu1 %v3773_v35  ;;  %5811 = vmatprep.mubr.f32.mxu0 %v3697_v9 }
 0x14f   :  { %5849 = vmatprep.subr.msk.mxu1 %vm2343_vm15, %v6247_v58  ;;  %5836 = vmatpush3.xpose.msra.mxu0 %v6724_v16  ;;  %v2335_v16 = vmul.f32 %v6176_v43, %v2306_v39  ;;  %v2336_v63 = vmul.f32 %v6170_v40, %v2306_v39  ;;  %v2314_v21 = vrot.slane %v2285_v6, %v6081_v13 }
 0x150   :  { %5865 = vmatprep.subr.mxu0 %v6708_v41 }
 0x151   :  { %5812 = vmatmul.mubr.f32.gmra.mxu0 %v3707_v11  ;;  %5822 = vmatmul.mubr.f32.vlgmr.msra.gmra.mxu1 %v6680_v20  ;;  %v2340_v45 = vmul.f32 %v6170_v40, %v2314_v21 }
 0x152   :  { %5850 = vmatpush3.xpose.msk.msra.mxu1 %vm2343_vm15, %v6247_v58  ;;  %5814 = vmatprep.mubr.f32.mxu0 %v3717_v42 }
 0x153   :  { %5824 = vmatprep.mubr.f32.mxu1 %v6689_v54  ;;  %5851 = vmatprep.subr.msk.mxu1 %vm2343_vm15, %v6252_v59 }
 0x155   :  { %5815 = vmatmul.mubr.f32.gmra.mxu0 %v3727_v8  ;;  %5825 = vmatmul.mubr.f32.gmra.mxu1 %v6710_v33 }
 0x156   :  { %5827 = vmatprep.mubr.f32.mxu1 %v6717_v5  ;;  %5837 = vmatprep.mubr.f32.mxu0 %v6684_v44  ;;  %v4371_v44 = vsel %vm2343_vm15, %v6327_v18, 0 }
 0x157   :  { %5852 = vmatpush3.xpose.msk.msra.mxu1 %vm2343_vm15, %v6252_v59  ;;  %v6886_v52 = vsub.f32 %v4371_v44, %v4371_v44 }
 0x158   :  { %5881 = vmatprep.subr.msk.mxu1 %vm2343_vm15, %v6247_v58 }
 0x159   :  { %5828 = vmatmul.mubr.f32.gmra.mxu1 %v6740_v15  ;;  %5838 = vmatmul.mubr.f32.vlgmr.msra.gmra.mxu0 %v6700_v1  ;;  %v4353_v1 = vsel %vm2343_vm15, %v2337_v0, 0 }
 0x15a   :  { %5830 = vmatprep.mubr.f32.mxu1 %v6748_v37  ;;  %5840 = vmatprep.mubr.f32.mxu0 %v6715_v23  ;;  %v6902_v4 = vand.u32 4294901760, %v4353_v1 }
 0x15b   :  { %5866 = vmatpush3.xpose.msra.mxu0 %v6708_v41  ;;  %v4347_v41 = vsel %vm2343_vm15, %v2335_v16, 0 }
 0x15c   :  { %5867 = vmatprep.subr.mxu0 %v6754_v46 }
 0x15d   :  { %5831 = vmatmul.mubr.f32.gmra.mxu1 %v6768_v24  ;;  %5841 = vmatmul.mubr.f32.gmra.mxu0 %v6738_v28  ;;  %v6909_v28 = vand.u32 4294901760, %v6886_v52 }
 0x15e   :  { %5843 = vmatprep.mubr.f32.mxu0 %v6746_v55  ;;  %5853 = vmatprep.mubr.f32.mxu1 %v3655_v30  ;;  %v6875_v30 = vand.u32 4294901760, %v4347_v41 }
 0x15f   :  { %5868 = vmatpush3.xpose.msra.mxu0 %v6754_v46  ;;  %v4350_v46 = vsel %vm2343_vm15, %v2336_v63, 0  ;;  %v4562_v47 = vsub.f32 %v6886_v52, %v6909_v28 }
 0x160   :  { %5897 = vmatprep.subr.msk.mxu0 %vm2343_vm15, %v6311_v12  ;;  %v6895_v23 = vsub.f32 %v4347_v41, %v6875_v30 }
 0x161   :  { %5844 = vmatmul.mubr.f32.gmra.mxu0 %v6766_v61  ;;  %5854 = vmatmul.mubr.f32.vlgmr.msra.gmra.mxu1 %v3665_v62  ;;  %v2339_v62 = vmul.f32 %v6176_v43, %v2314_v21  ;;  %v4362_v61 = vsel %vm2343_vm15, %v2340_v45, 0  ;;  %v4563_v53 = vand.u32 4294901760, %v4562_v47 }
 0x162   :  { %5882 = vmatpush3.xpose.msk.msra.mxu1 %vm2343_vm15, %v6247_v58  ;;  %5846 = vmatprep.mubr.f32.mxu0 %v6778_v26  ;;  %v2318_v58 = vrot.slane %v2286_v22, %v6081_v13  ;;  %v4356_v13 = vsel %vm2343_vm15, %v2338_v2, 0  ;;  %v4445_v55 = vand.u32 4294901760, %v6895_v23  ;;  %v6949_v9 = vand.u32 4294901760, %v4362_v61 }
 0x163   :  { %5856 = vmatprep.mubr.f32.mxu1 %v3675_v17  ;;  %5883 = vmatprep.subr.msk.mxu1 %vm2343_vm15, %v6252_v59  ;;  %v6897_v17 = vand.u32 4294901760, %v4350_v46  ;;  %v6920_v35 = vand.u32 4294901760, %v4356_v13 }
 0x164   :  { %v2341_v34 = vmul.f32 %v6176_v43, %v2318_v58  ;;  %v6926_v43 = vsub.f32 %v4353_v1, %v6902_v4  ;;  %v6970_v60 = vsub.f32 %v4362_v61, %v6949_v9 }
 0x165   :  { %5847 = vmatmul.mubr.f32.gmra.mxu0 %v6794_v3  ;;  %5857 = vmatmul.mubr.f32.gmra.mxu1 %v3685_v29  ;;  %v4359_v29 = vsel %vm2343_vm15, %v2339_v62, 0  ;;  %v6947_v25 = vsub.f32 %v4356_v13, %v6920_v35 }
 0x166   :  { %5859 = vmatprep.mubr.f32.mxu1 %v3695_v19  ;;  %5869 = vmatprep.mubr.f32.mxu0 %v6667_v7  ;;  %v6918_v19 = vsub.f32 %v4350_v46, %v6897_v17  ;;  %v4365_v26 = vsel %vm2343_vm15, %v2341_v34, 0  ;;  %v4465_v3 = vand.u32 4294901760, %v6926_v43  ;;  %v4495_v16 = vand.u32 4294901760, %v6970_v60 }
 0x167   :  { %5884 = vmatpush3.xpose.msk.msra.mxu1 %vm2343_vm15, %v6252_v59  ;;  %v6928_v59 = vand.u32 4294901760, %v4359_v29  ;;  %v6957_v14 = vand.u32 4294901760, %v4365_v26  ;;  %v4475_v42 = vand.u32 4294901760, %v6947_v25 }
 0x168   :  { %5913 = vmatprep.subr.mxu1 %v4556_v27  ;;  %v4466_v51 = vsub.f32 %v6926_v43, %v4465_v3 }
 0x169   :  { %5860 = vmatmul.mubr.f32.gmra.mxu1 %v3705_v31  ;;  %5870 = vmatmul.mubr.f32.vlgmr.msra.gmra.mxu0 %v6680_v20  ;;  %v2342_v31 = vmul.f32 %v6170_v40, %v2318_v58  ;;  %v4446_v40 = vsub.f32 %v6895_v23, %v4445_v55  ;;  %v6980_v48 = vsub.f32 %v4365_v26, %v6957_v14 }
 0x16a   :  { %5862 = vmatprep.mubr.f32.mxu1 %v3715_v56  ;;  %5872 = vmatprep.mubr.f32.mxu0 %v6689_v54  ;;  %v4455_v56 = vand.u32 4294901760, %v6918_v19  ;;  %v4476_v38 = vsub.f32 %v6947_v25, %v4475_v42  ;;  %v4467_v6 = vand.u32 4294901760, %v4466_v51 }
 0x16b   :  { %5898 = vmatpush3.xpose.msk.msra.mxu0 %vm2343_vm15, %v6311_v12  ;;  %v4368_v11 = vsel %vm2343_vm15, %v2342_v31, 0  ;;  %v4447_v10 = vand.u32 4294901760, %v4446_v40 }
 0x16c   :  { %5899 = vmatprep.subr.msk.mxu0 %vm2343_vm15, %v6327_v18  ;;  %v6972_v8 = vand.u32 4294901760, %v4368_v11  ;;  %v4477_v63 = vand.u32 4294901760, %v4476_v38 }
 0x16d   :  { %5863 = vmatmul.mubr.f32.gmra.mxu1 %v3725_v36  ;;  %5873 = vmatmul.mubr.f32.gmra.mxu0 %v6710_v33  ;;  %v6955_v36 = vsub.f32 %v4359_v29, %v6928_v59 }
 0x16e   :  { %5875 = vmatprep.mubr.f32.mxu0 %v6717_v5  ;;  %5885 = vmatprep.mubr.f32.mxu1 %v6667_v7  ;;  %v4456_v7 = vsub.f32 %v6918_v19, %v4455_v56  ;;  %v6990_v50 = vsub.f32 %v4368_v11, %v6972_v8 }
 0x16f   :  { %5900 = vmatpush3.xpose.msk.msra.mxu0 %vm2343_vm15, %v6327_v18 }
 0x170   :  { %5929 = vmatprep.subr.mxu0 %v6843_v57  ;;  %v4457_v39 = vand.u32 4294901760, %v4456_v7  ;;  %v4515_v41 = vand.u32 4294901760, %v6990_v50 }
 0x171   :  { %5876 = vmatmul.mubr.f32.gmra.mxu0 %v6740_v15  ;;  %5886 = vmatmul.mubr.f32.vlgmr.msra.gmra.mxu1 %v6680_v20  ;;  %v4485_v20 = vand.u32 4294901760, %v6955_v36 }
 0x172   :  { %5914 = vmatpush3.xpose.msra.mxu1 %v4556_v27  ;;  %5878 = vmatprep.mubr.f32.mxu0 %v6748_v37  ;;  %v4516_v22 = vsub.f32 %v6990_v50, %v4515_v41 }
 0x173   :  { %5888 = vmatprep.mubr.f32.mxu1 %v6689_v54  ;;  %5915 = vmatprep.subr.mxu1 %v4563_v53  ;;  %v4486_v54 = vsub.f32 %v6955_v36, %v4485_v20 }
 0x175   :  { %5879 = vmatmul.mubr.f32.gmra.mxu0 %v6768_v24  ;;  %5889 = vmatmul.mubr.f32.gmra.mxu1 %v6710_v33  ;;  %v4505_v33 = vand.u32 4294901760, %v6980_v48  ;;  %v4487_v0 = vand.u32 4294901760, %v4486_v54 }
 0x176   :  { %5891 = vmatprep.mubr.f32.mxu1 %v6717_v5  ;;  %5901 = vmatprep.mubr.f32.mxu0 %v4447_v10  ;;  %v4496_v5 = vsub.f32 %v6970_v60, %v4495_v16 }
 0x177   :  { %5916 = vmatpush3.xpose.msra.mxu1 %v4563_v53  ;;  %v4506_v21 = vsub.f32 %v6980_v48, %v4505_v33 }
 0x178   :  { %5945 = vmatprep.subr.msk.mxu1 %vm2343_vm15, %v6311_v12 }
 0x179   :  { %5892 = vmatmul.mubr.f32.gmra.mxu1 %v6740_v15  ;;  %5902 = vmatmul.mubr.f32.vlgmr.msra.gmra.mxu0 %v4457_v39  ;;  %v4497_v15 = vand.u32 4294901760, %v4496_v5  ;;  %v4507_v49 = vand.u32 4294901760, %v4506_v21 }
 0x17a   :  { %5894 = vmatprep.mubr.f32.mxu1 %v6748_v37  ;;  %5904 = vmatprep.mubr.f32.mxu0 %v4467_v6  ;;  %v4517_v37 = vand.u32 4294901760, %v4516_v22 }
 0x17b   :  { %5930 = vmatpush3.xpose.msra.mxu0 %v6843_v57 }
 0x17c   :  { %5931 = vmatprep.subr.mxu0 %v6886_v52 }
 0x17d   :  { %5895 = vmatmul.mubr.f32.gmra.mxu1 %v6768_v24  ;;  %5905 = vmatmul.mubr.f32.gmra.mxu0 %v4477_v63 }
 0x17e   :  { %5907 = vmatprep.mubr.f32.mxu0 %v4487_v0  ;;  %5917 = vmatprep.mubr.f32.mxu1 %v6875_v30 }
 0x17f   :  { %5932 = vmatpush3.xpose.msra.mxu0 %v6886_v52 }
 0x180   :  { %5961 = vmatprep.subr.mxu0 %v6854_v32 }
 0x181   :  { %5908 = vmatmul.mubr.f32.gmra.mxu0 %v4497_v15  ;;  %5918 = vmatmul.mubr.f32.vlgmr.msra.gmra.mxu1 %v6897_v17 }
 0x182   :  { %5946 = vmatpush3.xpose.msk.msra.mxu1 %vm2343_vm15, %v6311_v12  ;;  %5910 = vmatprep.mubr.f32.mxu0 %v4507_v49 }
 0x183   :  { %5920 = vmatprep.mubr.f32.mxu1 %v6902_v4  ;;  %5947 = vmatprep.subr.msk.mxu1 %vm2343_vm15, %v6327_v18 }
 0x185   :  { %5911 = vmatmul.mubr.f32.gmra.mxu0 %v4517_v37  ;;  %5921 = vmatmul.mubr.f32.gmra.mxu1 %v6920_v35 }
 0x186   :  { %5923 = vmatprep.mubr.f32.mxu1 %v6928_v59  ;;  %5933 = vmatprep.mubr.f32.mxu0 %v6895_v23 }
 0x187   :  { %5948 = vmatpush3.xpose.msk.msra.mxu1 %vm2343_vm15, %v6327_v18 }
 0x188   :  { %5977 = vmatprep.subr.msk.mxu1 %vm2343_vm15, %v6311_v12 }
 0x189   :  { %5924 = vmatmul.mubr.f32.gmra.mxu1 %v6949_v9  ;;  %5934 = vmatmul.mubr.f32.vlgmr.msra.gmra.mxu0 %v6918_v19 }
 0x18a   :  { %5926 = vmatprep.mubr.f32.mxu1 %v6957_v14  ;;  %5936 = vmatprep.mubr.f32.mxu0 %v6926_v43 }
 0x18b   :  { %5962 = vmatpush3.xpose.msra.mxu0 %v6854_v32 }
 0x18c   :  { %5963 = vmatprep.subr.mxu0 %v6909_v28 }
 0x18d   :  { %5927 = vmatmul.mubr.f32.gmra.mxu1 %v6972_v8  ;;  %5937 = vmatmul.mubr.f32.gmra.mxu0 %v6947_v25 }
 0x18e   :  { %5939 = vmatprep.mubr.f32.mxu0 %v6955_v36  ;;  %5949 = vmatprep.mubr.f32.mxu1 %v4445_v55 }
 0x18f   :  { %5964 = vmatpush3.xpose.msra.mxu0 %v6909_v28 }
 0x191   :  { %5940 = vmatmul.mubr.f32.gmra.mxu0 %v6970_v60  ;;  %5950 = vmatmul.mubr.f32.vlgmr.msra.gmra.mxu1 %v4455_v56 }
 0x192   :  { %5978 = vmatpush3.xpose.msk.msra.mxu1 %vm2343_vm15, %v6311_v12  ;;  %5942 = vmatprep.mubr.f32.mxu0 %v6980_v48 }
 0x193   :  { %5952 = vmatprep.mubr.f32.mxu1 %v4465_v3  ;;  %5979 = vmatprep.subr.msk.mxu1 %vm2343_vm15, %v6327_v18 }
 0x195   :  { %5943 = vmatmul.mubr.f32.gmra.mxu0 %v6990_v50  ;;  %5953 = vmatmul.mubr.f32.gmra.mxu1 %v4475_v42 }
 0x196   :  { %5955 = vmatprep.mubr.f32.mxu1 %v4485_v20  ;;  %5965 = vmatprep.mubr.f32.mxu0 %v6875_v30 }
 0x197   :  { %5980 = vmatpush3.xpose.msk.msra.mxu1 %vm2343_vm15, %v6327_v18 }
 0x199   :  { %5956 = vmatmul.mubr.f32.gmra.mxu1 %v4495_v16  ;;  %5966 = vmatmul.mubr.f32.vlgmr.msra.gmra.mxu0 %v6897_v17 }
 0x19a   :  { %5958 = vmatprep.mubr.f32.mxu1 %v4505_v33  ;;  %5968 = vmatprep.mubr.f32.mxu0 %v6902_v4 }
 0x19d   :  { %5959 = vmatmul.mubr.f32.gmra.mxu1 %v4515_v41  ;;  %5969 = vmatmul.mubr.f32.gmra.mxu0 %v6920_v35 }
 0x19e   :  { %5971 = vmatprep.mubr.f32.mxu0 %v6928_v59  ;;  %5981 = vmatprep.mubr.f32.mxu1 %v6875_v30 }
 0x1a1   :  { %5972 = vmatmul.mubr.f32.gmra.mxu0 %v6949_v9  ;;  %5982 = vmatmul.mubr.f32.vlgmr.msra.gmra.mxu1 %v6897_v17 }
 0x1a2   :  { %5974 = vmatprep.mubr.f32.mxu0 %v6957_v14  ;;  %5984 = vmatprep.mubr.f32.mxu1 %v6902_v4 }
 0x1a5   :  { %5975 = vmatmul.mubr.f32.gmra.mxu0 %v6972_v8  ;;  %5985 = vmatmul.mubr.f32.gmra.mxu1 %v6920_v35 }
 0x1a6   :  { %5987 = vmatprep.mubr.f32.mxu1 %v6928_v59 }
 0x1a9   :  { %5988 = vmatmul.mubr.f32.gmra.mxu1 %v6949_v9 }
 0x1aa   :  { %5990 = vmatprep.mubr.f32.mxu1 %v6957_v14 }
 0x1ad   :  { %5991 = vmatmul.mubr.f32.gmra.mxu1 %v6972_v8 }
 0x1d3   :  { %v5687_v12 = vpop.f32.mrf.mxu0 }
 0x1d5   :  { %v2435_v18 = vpop.f32.mrf.mxu0 }
 0x1d7   :  { %v5690_v24 = vpop.f32.mrf.mxu0 }
 0x1d9   :  { %v2455_v57 = vpop.f32.mrf.mxu0 }
 0x1db   :  { %v5697_v32 = vpop.f32.mrf.mxu1 }
 0x1dc   :  { %v5707_v44 = vpop.f32.mrf.mxu0  ;;  %v2553_v62 = vadd.f32 %v5697_v32, %v5687_v12 }
 0x1dd   :  { %v2546_v30 = vpop.f32.mrf.mxu1 }
 0x1de   :  { %v2640_v46 = vpop.f32.mrf.mxu0  ;;  %v2547_v27 = vadd.f32 %v2546_v30, %v2435_v18  ;;  %v2648_v4 = vadd.f32 %v5707_v44, %v2553_v62 }
 0x1df   :  { %v5700_v2 = vpop.f32.mrf.mxu1 }
 0x1e0   :  { %v5710_v52 = vpop.f32.mrf.mxu0  ;;  %v2565_v13 = vadd.f32 %v5700_v2, %v5690_v24  ;;  %v2641_v29 = vadd.f32 %v2640_v46, %v2547_v27 }
 0x1e1   :  { %v2558_v1 = vpop.f32.mrf.mxu1 }
 0x1e2   :  { %v2654_v58 = vpop.f32.mrf.mxu0  ;;  %v2559_v34 = vadd.f32 %v2558_v1, %v2455_v57  ;;  %v2662_v43 = vadd.f32 %v5710_v52, %v2565_v13 }
 0x1e4   :  { %v5717_v23 = vpop.f32.mrf.mxu1  ;;  %v2655_v47 = vadd.f32 %v2654_v58, %v2559_v34 }
 0x1e5   :  { %v5727_v17 = vpop.f32.mrf.mxu0  ;;  %v2745_v55 = vadd.f32 %v5717_v23, %v2648_v4 }
 0x1e6   :  { %v2736_v45 = vpop.f32.mrf.mxu1 }
 0x1e7   :  { %v2837_v28 = vpop.f32.mrf.mxu0  ;;  %v2737_v59 = vadd.f32 %v2736_v45, %v2641_v29  ;;  %v2844_v26 = vadd.f32 %v5727_v17, %v2745_v55 }
 0x1e8   :  { %v5720_v19 = vpop.f32.mrf.mxu1 }
 0x1e9   :  { %v5730_v35 = vpop.f32.mrf.mxu0  ;;  %v2761_v40 = vadd.f32 %v5720_v19, %v2662_v43  ;;  %v2838_v25 = vadd.f32 %v2837_v28, %v2737_v59 }
 0x1ea   :  { %v2752_v61 = vpop.f32.mrf.mxu1 }
 0x1eb   :  { %v2849_v31 = vpop.f32.mrf.mxu0  ;;  %v2753_v9 = vadd.f32 %v2752_v61, %v2655_v47  ;;  %v2856_v11 = vadd.f32 %v5730_v35, %v2761_v40 }
 0x1ed   :  { %v5737_v56 = vpop.f32.mrf.mxu1  ;;  %v2850_v60 = vadd.f32 %v2849_v31, %v2753_v9 }
 0x1ee   :  { %v2935_v3 = vadd.f32 %v5737_v56, %v2844_v26  ;;  %v5747_v36 = vpop.f32.mrf.mxu0 }
 0x1ef   :  { %v2928_v14 = vpop.f32.mrf.mxu1 }
 0x1f0   :  { %5137 = vst.msk [vmem:[#allocation2 + $0x8] sm:$0xff] %vm71_vm0, %v2935_v3  ;;  %v2929_v53 = vadd.f32 %v2928_v14, %v2838_v25  ;;  %v3041_v7 = vpop.f32.mrf.mxu0 }
 0x1f1   :  { %v5740_v42 = vpop.f32.mrf.mxu1 }
 0x1f2   :  { %5136 = vst.msk [vmem:[#allocation2] sm:$0xff] %vm71_vm0, %v2929_v53  ;;  %v2947_v8 = vadd.f32 %v5740_v42, %v2856_v11  ;;  %v5750_v10 = vpop.f32.mrf.mxu0 }
 0x1f3   :  { %v2940_v51 = vpop.f32.mrf.mxu1 }
 0x1f4   :  { %5139 = vst.msk [vmem:[#allocation2 + $0x18] sm:$0xff] %vm71_vm0, %v2947_v8  ;;  %v2941_v20 = vadd.f32 %v2940_v51, %v2850_v60  ;;  %v3061_v48 = vpop.f32.mrf.mxu0 }
 0x1f6   :  { %5138 = vst.msk [vmem:[#allocation2 + $0x10] sm:$0xff] %vm71_vm0, %v2941_v20  ;;  %v5757_v39 = vpop.f32.mrf.mxu1 }
 0x1f7   :  { %v5767_v38 = vpop.f32.mrf.mxu0  ;;  %v3159_v63 = vadd.f32 %v5757_v39, %v5747_v36 }
 0x1f8   :  { %v3152_v16 = vpop.f32.mrf.mxu1 }
 0x1f9   :  { %v3246_v50 = vpop.f32.mrf.mxu0  ;;  %v3153_v41 = vadd.f32 %v3152_v16, %v3041_v7  ;;  %v3254_v15 = vadd.f32 %v5767_v38, %v3159_v63 }
 0x1fa   :  { %v5760_v6 = vpop.f32.mrf.mxu1 }
 0x1fb   :  { %v5770_v54 = vpop.f32.mrf.mxu0  ;;  %v3171_v22 = vadd.f32 %v5760_v6, %v5750_v10  ;;  %v3247_v12 = vadd.f32 %v3246_v50, %v3153_v41 }
 0x1fc   :  { %v3164_v33 = vpop.f32.mrf.mxu1 }
 0x1fd   :  { %v3260_v5 = vpop.f32.mrf.mxu0  ;;  %v3165_v18 = vadd.f32 %v3164_v33, %v3061_v48  ;;  %v3268_v44 = vadd.f32 %v5770_v54, %v3171_v22 }
 0x1ff   :  { %v5777_v0 = vpop.f32.mrf.mxu1  ;;  %v3261_v52 = vadd.f32 %v3260_v5, %v3165_v18 }
 0x200   :  { %v5787_v21 = vpop.f32.mrf.mxu0  ;;  %v3351_v24 = vadd.f32 %v5777_v0, %v3254_v15 }
 0x201   :  { %v3342_v49 = vpop.f32.mrf.mxu1 }
 0x202   :  { %v3443_v37 = vpop.f32.mrf.mxu0  ;;  %v3343_v30 = vadd.f32 %v3342_v49, %v3247_v12  ;;  %v3450_v1 = vadd.f32 %v5787_v21, %v3351_v24 }
 0x203   :  { %v5780_v57 = vpop.f32.mrf.mxu1 }
 0x204   :  { %v5790_v32 = vpop.f32.mrf.mxu0  ;;  %v3367_v62 = vadd.f32 %v5780_v57, %v3268_v44  ;;  %v3444_v27 = vadd.f32 %v3443_v37, %v3343_v30 }
 0x205   :  { %v3358_v46 = vpop.f32.mrf.mxu1 }
 0x206   :  { %v3455_v2 = vpop.f32.mrf.mxu0  ;;  %v3359_v23 = vadd.f32 %v3358_v46, %v3261_v52  ;;  %v3462_v45 = vadd.f32 %v5790_v32, %v3367_v62 }
 0x208   :  { %v5797_v58 = vpop.f32.mrf.mxu1  ;;  %v3456_v55 = vadd.f32 %v3455_v2, %v3359_v23 }
 0x209   :  { %v3541_v17 = vadd.f32 %v5797_v58, %v3450_v1  ;;  %v5807_v4 = vpop.f32.mrf.mxu0 }
 0x20a   :  { %v3534_v13 = vpop.f32.mrf.mxu1 }
 0x20b   :  { %5141 = vst.msk [vmem:[#allocation2 + $0x68] sm:$0xff] %vm71_vm0, %v3541_v17  ;;  %v3535_v28 = vadd.f32 %v3534_v13, %v3444_v27  ;;  %v3659_v29 = vpop.f32.mrf.mxu0 }
 0x20c   :  { %v5800_v34 = vpop.f32.mrf.mxu1 }
 0x20d   :  { %5140 = vst.msk [vmem:[#allocation2 + $0x60] sm:$0xff] %vm71_vm0, %v3535_v28  ;;  %v3553_v19 = vadd.f32 %v5800_v34, %v3462_v45  ;;  %v5810_v35 = vpop.f32.mrf.mxu0 }
 0x20e   :  { %v3546_v43 = vpop.f32.mrf.mxu1 }
 0x20f   :  { %5143 = vst.msk [vmem:[#allocation2 + $0x78] sm:$0xff] %vm71_vm0, %v3553_v19  ;;  %v3547_v59 = vadd.f32 %v3546_v43, %v3456_v55  ;;  %v3679_v61 = vpop.f32.mrf.mxu0 }
 0x211   :  { %5142 = vst.msk [vmem:[#allocation2 + $0x70] sm:$0xff] %vm71_vm0, %v3547_v59  ;;  %v5813_v31 = vpop.f32.mrf.mxu0  ;;  %v5823_v47 = vpop.f32.mrf.mxu1 }
 0x212   :  { %v3817_v33 = vadd.f32 %v5823_v47, %v5807_v4 }
 0x213   :  { %v3699_v26 = vpop.f32.mrf.mxu0  ;;  %v3810_v40 = vpop.f32.mrf.mxu1 }
 0x214   :  { %v3811_v41 = vadd.f32 %v3810_v40, %v3659_v29 }
 0x215   :  { %v5816_v56 = vpop.f32.mrf.mxu0  ;;  %v5826_v25 = vpop.f32.mrf.mxu1 }
 0x216   :  { %v3829_v22 = vadd.f32 %v5826_v25, %v5810_v35 }
 0x217   :  { %v3719_v9 = vpop.f32.mrf.mxu0  ;;  %v3822_v3 = vpop.f32.mrf.mxu1 }
 0x218   :  { %v3823_v24 = vadd.f32 %v3822_v3, %v3679_v61 }
 0x219   :  { %v5829_v36 = vpop.f32.mrf.mxu1  ;;  %v5839_v14 = vpop.f32.mrf.mxu0 }
 0x21a   :  { %v3936_v0 = vadd.f32 %v5839_v14, %v3817_v33  ;;  %v3841_v30 = vadd.f32 %v5829_v36, %v5813_v31 }
 0x21b   :  { %v3834_v11 = vpop.f32.mrf.mxu1  ;;  %v3928_v53 = vpop.f32.mrf.mxu0 }
 0x21c   :  { %v3929_v49 = vadd.f32 %v3928_v53, %v3811_v41  ;;  %v3835_v27 = vadd.f32 %v3834_v11, %v3699_v26 }
 0x21d   :  { %v5832_v7 = vpop.f32.mrf.mxu1  ;;  %v5842_v42 = vpop.f32.mrf.mxu0 }
 0x21e   :  { %v3950_v57 = vadd.f32 %v5842_v42, %v3829_v22  ;;  %v3853_v29 = vadd.f32 %v5832_v7, %v5816_v56 }
 0x21f   :  { %v3846_v60 = vpop.f32.mrf.mxu1  ;;  %v3942_v8 = vpop.f32.mrf.mxu0 }
 0x220   :  { %v3943_v52 = vadd.f32 %v3942_v8, %v3823_v24  ;;  %v3847_v61 = vadd.f32 %v3846_v60, %v3719_v9 }
 0x221   :  { %v5845_v10 = vpop.f32.mrf.mxu0  ;;  %v5855_v51 = vpop.f32.mrf.mxu1 }
 0x222   :  { %v4061_v37 = vadd.f32 %v5855_v51, %v3936_v0  ;;  %v3964_v4 = vadd.f32 %v5845_v10, %v3841_v30 }
 0x223   :  { %v3956_v20 = vpop.f32.mrf.mxu0  ;;  %v4052_v48 = vpop.f32.mrf.mxu1 }
 0x224   :  { %v4053_v32 = vadd.f32 %v4052_v48, %v3929_v49  ;;  %v3957_v19 = vadd.f32 %v3956_v20, %v3835_v27 }
 0x225   :  { %v5848_v39 = vpop.f32.mrf.mxu0  ;;  %v5858_v38 = vpop.f32.mrf.mxu1 }
 0x226   :  { %v4077_v1 = vadd.f32 %v5858_v38, %v3950_v57  ;;  %v3978_v26 = vadd.f32 %v5848_v39, %v3853_v29 }
 0x227   :  { %v3970_v16 = vpop.f32.mrf.mxu0  ;;  %v4068_v50 = vpop.f32.mrf.mxu1 }
 0x228   :  { %v4069_v13 = vadd.f32 %v4068_v50, %v3943_v52  ;;  %v3971_v56 = vadd.f32 %v3970_v16, %v3847_v61 }
 0x229   :  { %v5861_v6 = vpop.f32.mrf.mxu1  ;;  %v5871_v54 = vpop.f32.mrf.mxu0 }
 0x22a   :  { %v4192_v44 = vadd.f32 %v5871_v54, %v4061_v37  ;;  %v4093_v35 = vadd.f32 %v5861_v6, %v3964_v4 }
 0x22b   :  { %v4084_v63 = vpop.f32.mrf.mxu1  ;;  %v4185_v5 = vpop.f32.mrf.mxu0 }
 0x22c   :  { %v4186_v62 = vadd.f32 %v4185_v5, %v4053_v32  ;;  %v4085_v40 = vadd.f32 %v4084_v63, %v3957_v19 }
 0x22d   :  { %v5864_v21 = vpop.f32.mrf.mxu1  ;;  %v5874_v15 = vpop.f32.mrf.mxu0 }
 0x22e   :  { %v4204_v45 = vadd.f32 %v5874_v15, %v4077_v1  ;;  %v4109_v11 = vadd.f32 %v5864_v21, %v3978_v26 }
 0x22f   :  { %v4100_v12 = vpop.f32.mrf.mxu1  ;;  %v4197_v18 = vpop.f32.mrf.mxu0 }
 0x230   :  { %v4198_v43 = vadd.f32 %v4197_v18, %v4069_v13  ;;  %v4101_v10 = vadd.f32 %v4100_v12, %v3971_v56 }
 0x231   :  { %v5877_v46 = vpop.f32.mrf.mxu0  ;;  %v5887_v2 = vpop.f32.mrf.mxu1 }
 0x232   :  { %v4307_v58 = vadd.f32 %v5887_v2, %v4192_v44  ;;  %v4216_v25 = vadd.f32 %v5877_v46, %v4093_v35 }
 0x233   :  { %v4209_v23 = vpop.f32.mrf.mxu0  ;;  %v4300_v17 = vpop.f32.mrf.mxu1 }
 0x234   :  { %5146 = vst.msk [vmem:[#allocation2 + $0x28] sm:$0xff] %vm71_vm0, %v4307_v58  ;;  %v4301_v28 = vadd.f32 %v4300_v17, %v4186_v62  ;;  %v4210_v53 = vadd.f32 %v4209_v23, %v4085_v40 }
 0x235   :  { %v5880_v34 = vpop.f32.mrf.mxu0  ;;  %v5890_v55 = vpop.f32.mrf.mxu1 }
 0x236   :  { %5145 = vst.msk [vmem:[#allocation2 + $0x20] sm:$0xff] %vm71_vm0, %v4301_v28  ;;  %v4319_v59 = vadd.f32 %v5890_v55, %v4204_v45  ;;  %v4228_v9 = vadd.f32 %v5880_v34, %v4109_v11 }
 0x237   :  { %v4221_v31 = vpop.f32.mrf.mxu0  ;;  %v4312_v47 = vpop.f32.mrf.mxu1 }
 0x238   :  { %5148 = vst.msk [vmem:[#allocation2 + $0x38] sm:$0xff] %vm71_vm0, %v4319_v59  ;;  %v4313_v3 = vadd.f32 %v4312_v47, %v4198_v43  ;;  %v4222_v48 = vadd.f32 %v4221_v31, %v4101_v10 }
 0x239   :  { %v5893_v36 = vpop.f32.mrf.mxu1  ;;  %v5903_v14 = vpop.f32.mrf.mxu0 }
 0x23a   :  { %5147 = vst.msk [vmem:[#allocation2 + $0x30] sm:$0xff] %vm71_vm0, %v4313_v3  ;;  %v4331_v7 = vadd.f32 %v5893_v36, %v4216_v25 }
 0x23b   :  { %v4324_v42 = vpop.f32.mrf.mxu1  ;;  %v4449_v8 = vpop.f32.mrf.mxu0 }
 0x23c   :  { %5150 = vst.msk [vmem:[#allocation2 + $0x48] sm:$0xff] %vm71_vm0, %v4331_v7  ;;  %v4325_v60 = vadd.f32 %v4324_v42, %v4210_v53 }
 0x23d   :  { %v5896_v51 = vpop.f32.mrf.mxu1  ;;  %v5906_v20 = vpop.f32.mrf.mxu0 }
 0x23e   :  { %5149 = vst.msk [vmem:[#allocation2 + $0x40] sm:$0xff] %vm71_vm0, %v4325_v60  ;;  %v4343_v39 = vadd.f32 %v5896_v51, %v4228_v9 }
 0x23f   :  { %v4336_v38 = vpop.f32.mrf.mxu1  ;;  %v4469_v16 = vpop.f32.mrf.mxu0 }
 0x240   :  { %5152 = vst.msk [vmem:[#allocation2 + $0x58] sm:$0xff] %vm71_vm0, %v4343_v39  ;;  %v4337_v50 = vadd.f32 %v4336_v38, %v4222_v48 }
 0x241   :  { %v5909_v6 = vpop.f32.mrf.mxu0  ;;  %v5919_v54 = vpop.f32.mrf.mxu1 }
 0x242   :  { %5151 = vst.msk [vmem:[#allocation2 + $0x50] sm:$0xff] %vm71_vm0, %v4337_v50  ;;  %v4607_v23 = vadd.f32 %v5919_v54, %v5903_v14 }
 0x243   :  { %v4489_v33 = vpop.f32.mrf.mxu0  ;;  %v4600_v63 = vpop.f32.mrf.mxu1 }
 0x244   :  { %v4601_v13 = vadd.f32 %v4600_v63, %v4449_v8 }
 0x245   :  { %v5912_v5 = vpop.f32.mrf.mxu0  ;;  %v5922_v41 = vpop.f32.mrf.mxu1 }
 0x246   :  { %v4619_v34 = vadd.f32 %v5922_v41, %v5906_v20 }
 0x247   :  { %v4509_v0 = vpop.f32.mrf.mxu0  ;;  %v4612_v21 = vpop.f32.mrf.mxu1 }
 0x248   :  { %v4613_v59 = vadd.f32 %v4612_v21, %v4469_v16 }
 0x249   :  { %v5925_v15 = vpop.f32.mrf.mxu1  ;;  %v5935_v22 = vpop.f32.mrf.mxu0 }
 0x24a   :  { %v4726_v45 = vadd.f32 %v5935_v22, %v4607_v23  ;;  %v4631_v26 = vadd.f32 %v5925_v15, %v5909_v6 }
 0x24b   :  { %v4624_v49 = vpop.f32.mrf.mxu1  ;;  %v4718_v37 = vpop.f32.mrf.mxu0 }
 0x24c   :  { %v4719_v55 = vadd.f32 %v4718_v37, %v4601_v13  ;;  %v4625_v11 = vadd.f32 %v4624_v49, %v4489_v33 }
 0x24d   :  { %v5928_v12 = vpop.f32.mrf.mxu1  ;;  %v5938_v18 = vpop.f32.mrf.mxu0 }
 0x24e   :  { %v4740_v61 = vadd.f32 %v5938_v18, %v4619_v34  ;;  %v4643_v60 = vadd.f32 %v5928_v12, %v5912_v5 }
 0x24f   :  { %v4636_v24 = vpop.f32.mrf.mxu1  ;;  %v4732_v57 = vpop.f32.mrf.mxu0 }
 0x250   :  { %v4733_v3 = vadd.f32 %v4732_v57, %v4613_v59  ;;  %v4637_v16 = vadd.f32 %v4636_v24, %v4509_v0 }
 0x251   :  { %v5941_v32 = vpop.f32.mrf.mxu0  ;;  %v5951_v44 = vpop.f32.mrf.mxu1 }
 0x252   :  { %v4851_v19 = vadd.f32 %v5951_v44, %v4726_v45  ;;  %v4754_v42 = vadd.f32 %v5941_v32, %v4631_v26 }
 0x253   :  { %v4746_v30 = vpop.f32.mrf.mxu0  ;;  %v4842_v46 = vpop.f32.mrf.mxu1 }
 0x254   :  { %v4843_v31 = vadd.f32 %v4842_v46, %v4719_v55  ;;  %v4747_v20 = vadd.f32 %v4746_v30, %v4625_v11 }
 0x255   :  { %v5944_v2 = vpop.f32.mrf.mxu0  ;;  %v5954_v52 = vpop.f32.mrf.mxu1 }
 0x256   :  { %v4867_v36 = vadd.f32 %v5954_v52, %v4740_v61  ;;  %v4768_v54 = vadd.f32 %v5944_v2, %v4643_v60 }
 0x257   :  { %v4760_v1 = vpop.f32.mrf.mxu0  ;;  %v4858_v62 = vpop.f32.mrf.mxu1 }
 0x258   :  { %v4859_v8 = vadd.f32 %v4858_v62, %v4733_v3  ;;  %v4761_v15 = vadd.f32 %v4760_v1, %v4637_v16 }
 0x259   :  { %v5957_v58 = vpop.f32.mrf.mxu1  ;;  %v5967_v27 = vpop.f32.mrf.mxu0 }
 0x25a   :  { %v4982_v47 = vadd.f32 %v5967_v27, %v4851_v19  ;;  %v4883_v48 = vadd.f32 %v5957_v58, %v4754_v42 }
 0x25b   :  { %v4874_v17 = vpop.f32.mrf.mxu1  ;;  %v4975_v4 = vpop.f32.mrf.mxu0 }
 0x25c   :  { %v4976_v14 = vadd.f32 %v4975_v4, %v4843_v31  ;;  %v4875_v33 = vadd.f32 %v4874_v17, %v4747_v20 }
 0x25d   :  { %v5960_v28 = vpop.f32.mrf.mxu1  ;;  %v5970_v29 = vpop.f32.mrf.mxu0 }
 0x25e   :  { %v4994_v10 = vadd.f32 %v5970_v29, %v4867_v36  ;;  %v4899_v22 = vadd.f32 %v5960_v28, %v4768_v54 }
 0x25f   :  { %v4890_v35 = vpop.f32.mrf.mxu1  ;;  %v4987_v43 = vpop.f32.mrf.mxu0 }
 0x260   :  { %v4988_v39 = vadd.f32 %v4987_v43, %v4859_v8  ;;  %v4891_v18 = vadd.f32 %v4890_v35, %v4761_v15 }
 0x261   :  { %v5973_v40 = vpop.f32.mrf.mxu0  ;;  %v5983_v25 = vpop.f32.mrf.mxu1 }
 0x262   :  { %v5097_v56 = vadd.f32 %v5983_v25, %v4982_v47  ;;  %v5006_v63 = vadd.f32 %v5973_v40, %v4883_v48 }
 0x263   :  { %v4999_v53 = vpop.f32.mrf.mxu0  ;;  %v5090_v7 = vpop.f32.mrf.mxu1 }
 0x264   :  { %5154 = vst.msk [vmem:[#allocation2 + $0x88] sm:$0xff] %vm71_vm0, %v5097_v56  ;;  %v5091_v9 = vadd.f32 %v5090_v7, %v4976_v14  ;;  %v5000_v5 = vadd.f32 %v4999_v53, %v4875_v33 }
 0x265   :  { %v5986_v51 = vpop.f32.mrf.mxu1  ;;  %v5976_v50 = vpop.f32.mrf.mxu0 }
 0x266   :  { %5153 = vst.msk [vmem:[#allocation2 + $0x80] sm:$0xff] %vm71_vm0, %v5091_v9  ;;  %v5109_v38 = vadd.f32 %v5986_v51, %v4994_v10  ;;  %v5018_v57 = vadd.f32 %v5976_v50, %v4899_v22 }
 0x267   :  { %v5102_v6 = vpop.f32.mrf.mxu1  ;;  %v5011_v37 = vpop.f32.mrf.mxu0 }
 0x268   :  { %5156 = vst.msk [vmem:[#allocation2 + $0x98] sm:$0xff] %vm71_vm0, %v5109_v38  ;;  %v5103_v41 = vadd.f32 %v5102_v6, %v4988_v39  ;;  %v5012_v32 = vadd.f32 %v5011_v37, %v4891_v18 }
 0x269   :  { %v5989_v21 = vpop.f32.mrf.mxu1 }
 0x26a   :  { %5155 = vst.msk [vmem:[#allocation2 + $0x90] sm:$0xff] %vm71_vm0, %v5103_v41  ;;  %v5121_v49 = vadd.f32 %v5989_v21, %v5006_v63 }
 0x26b   :  { %v5114_v12 = vpop.f32.mrf.mxu1 }
 0x26c   :  { %5158 = vst.msk [vmem:[#allocation2 + $0xa8] sm:$0xff] %vm71_vm0, %v5121_v49  ;;  %v5115_v0 = vadd.f32 %v5114_v12, %v5000_v5 }
 0x26d   :  { %v5992_v24 = vpop.f32.mrf.mxu1 }
 0x26e   :  { %5157 = vst.msk [vmem:[#allocation2 + $0xa0] sm:$0xff] %vm71_vm0, %v5115_v0  ;;  %v5133_v44 = vadd.f32 %v5992_v24, %v5018_v57 }
 0x26f   :  { %v5126_v30 = vpop.f32.mrf.mxu1 }
 0x270   :  { %5160 = vst.msk [vmem:[#allocation2 + $0xb8] sm:$0xff] %vm71_vm0, %v5133_v44  ;;  %v5127_v46 = vadd.f32 %v5126_v30, %v5012_v32 }
 0x272   :  { %5159 = vst.msk [vmem:[#allocation2 + $0xb0] sm:$0xff] %vm71_vm0, %v5127_v46 }
 0x273   :  { %6018 = shalt.err (!%p6015_p4)
}
 0x274   :  { %s6033_s18 = smov 128   ;;  %s6034_s19 = smov 8  }
 0x275   :  { %5172 = dma.vmem_to_hbm [thread:$0]  %s5167_s1, 3072, %s7102_s2, [#allocation3], %s6033_s18, %s6033_s18, %s6034_s19  }
 0x276   :  { %6027 = dma.done.wait [#allocation3], 3072  }
 0x277   :  { %6028 = vsyncadd [#allocation3], 4294964224 }
 0x278   :  { %5176 = vsyncpa [#allocation3], 1 }

</bundles_post_ra>
